<compile_context>
chip_gen: v7x
topology: tpu7x:2x2x1
jax: 0.10.0
libtpu: 0.0.40
codegen_flags: <defaults>
</compile_context>

<pallas_src>
import jax
import jax.numpy as jnp
from jax.experimental import pallas as pl
from jax.experimental.pallas import tpu as pltpu

EPS = 1e-5          # InstanceNorm1d default eps
NEG_SLOPE = 0.2     # LeakyReLU(0.2)
PAD = 8             # sublane-aligned data offset inside the padded scratch


def _instnorm_lrelu(h):
    # InstanceNorm1d (affine=False, biased variance) over the position axis
    # (axis 0 in (L, C) layout), then LeakyReLU(0.2).  All stats in f32.
    mean = jnp.mean(h, axis=0, keepdims=True)
    c = h - mean
    var = jnp.mean(c * c, axis=0, keepdims=True)
    y = c * jax.lax.rsqrt(var + EPS)
    return jnp.where(y >= 0.0, y, NEG_SLOPE * y)


def discriminator_forward(inp, expv, params):
    W1, b1, W2, b2, W3, b3, W5, b5, Wlin, blin = params
    f32, bf16 = jnp.float32, jnp.bfloat16
    B, C_in, L0 = inp.shape
    L1, L2, L3 = L0 // 2, L0 // 4, L0 // 8          # 48, 24, 12
    LP0 = L0 + 2                                    # padded input rows / sample

    # ---- trace-time weight preprocessing (weight-only, fused under jit) ----
    def flat_w(W):   # (Cout, Cin, 4) -> (4*Cin, Cout), row index = kk*Cin + cin
        return jnp.transpose(W, (2, 1, 0)).reshape(-1, W.shape[0])

    W1f = flat_w(W1).astype(bf16)                   # (16, 64)
    W2f = flat_w(W2).astype(bf16)                   # (256, 128)
    W3f = flat_w(W3).astype(bf16)                   # (512, 256)
    b1r = b1.reshape(1, -1).astype(f32)
    b2r = b2.reshape(1, -1).astype(f32)
    b3r = b3.reshape(1, -1).astype(f32)

    # Fold block5 (Conv1d(256,64,4,1,0)) + Linear(64*9+1, 1) into one mask:
    #   sigmoid( sum_{l,c} MeffT[l,c]*h3[l,c] + w_exp*exp + head_bias )
    hi = jax.lax.Precision.HIGHEST
    Wlin2d = Wlin[0, :64 * 9].reshape(64, 9).astype(f32)
    M = jnp.dot(W5.reshape(64, 256 * 4).astype(f32).T, Wlin2d, precision=hi)  # (1024, 9)
    M4 = M.reshape(256, 4, 9)
    Meff = jnp.zeros((256, L3), f32)
    for kk in range(4):
        Meff = Meff.at[:, kk:kk + 9].add(M4[:, kk, :])
    MeffT = Meff.T                                             # (12, 256), (L,C) layout
    head_bias = jnp.sum(b5.astype(f32)[:, None] * Wlin2d) + blin[0].astype(f32)
    w_exp = Wlin[0, 64 * 9].astype(f32)
    head_scalars = jnp.stack([w_exp, head_bias]).astype(f32)   # (2,)  -> SMEM
    exp_flat = expv.reshape(B).astype(f32)                     # (B,)  -> SMEM

    # Input: (B, C, L) -> (L, C) layout, zero-pad 1 row each side per sample,
    # samples stacked along rows: (B*(L0+2), C_in).
    x_lc = jnp.transpose(inp.astype(f32), (0, 2, 1))
    x_pad = jnp.pad(x_lc, ((0, 0), (1, 1), (0, 0))).reshape(B * LP0, C_in)

    def kernel(x_ref, w1_ref, b1_ref, w2_ref, b2_ref, w3_ref, b3_ref,
               meff_ref, exp_ref, sc_ref, o_ref, s1_ref, s2_ref):
        # Zero the padded-activation scratch once; pad rows stay zero since
        # only interior rows are overwritten per sample.
        s1_ref[...] = jnp.zeros(s1_ref.shape, f32)
        s2_ref[...] = jnp.zeros(s2_ref.shape, f32)

        def conv(taps, w_ref, b_ref):
            # Stack the 4 shifted taps along lanes -> ONE matmul (K = 4*C_in),
            # bf16 operands, f32 accumulate, then InstanceNorm + LeakyReLU.
            t = jnp.concatenate(taps, axis=-1).astype(bf16)
            h = jnp.dot(t, w_ref[...], preferred_element_type=f32) + b_ref[...]
            return _instnorm_lrelu(h)

        logits = []
        for b in range(B):                                     # static unroll (B tiny)
            # ---- layer 1: taps straight from the pre-padded input ----
            base = b * LP0
            taps = [x_ref[pl.ds(base + kk, L1, stride=2), :] for kk in range(4)]
            h1 = conv(taps, w1_ref, b1_ref)                    # (48, 64)
            s1_ref[pl.ds(PAD, L1), :] = h1                     # aligned interior write

            # ---- layer 2 ----
            taps = [s1_ref[pl.ds(PAD - 1 + kk, L2, stride=2), :] for kk in range(4)]
            h2 = conv(taps, w2_ref, b2_ref)                    # (24, 128)
            s2_ref[pl.ds(PAD, L2), :] = h2

            # ---- layer 3 ----
            taps = [s2_ref[pl.ds(PAD - 1 + kk, L3, stride=2), :] for kk in range(4)]
            h3 = conv(taps, w3_ref, b3_ref)                    # (12, 256), f32

            # ---- folded block5 + Linear head (f32) ----
            s = jnp.sum(h3 * meff_ref[...], keepdims=True)     # (1, 1)
            s = s + sc_ref[0] * exp_ref[b] + sc_ref[1]
            logits.append(s)

        z = jnp.concatenate(logits, axis=1)                    # (1, B), single store
        z = jnp.clip(z, -30.0, 30.0)
        o_ref[...] = 1.0 / (1.0 + jnp.exp(-z))

    out = pl.pallas_call(
        kernel,
        out_shape=jax.ShapeDtypeStruct((1, B), jnp.float32),
        in_specs=[
            pl.BlockSpec(memory_space=pltpu.VMEM),   # x_pad   (B*(L0+2), C_in)
            pl.BlockSpec(memory_space=pltpu.VMEM),   # W1f
            pl.BlockSpec(memory_space=pltpu.VMEM),   # b1
            pl.BlockSpec(memory_space=pltpu.VMEM),   # W2f
            pl.BlockSpec(memory_space=pltpu.VMEM),   # b2
            pl.BlockSpec(memory_space=pltpu.VMEM),   # W3f
            pl.BlockSpec(memory_space=pltpu.VMEM),   # b3
            pl.BlockSpec(memory_space=pltpu.VMEM),   # MeffT (folded head)
            pl.BlockSpec(memory_space=pltpu.SMEM),   # exp (B,)
            pl.BlockSpec(memory_space=pltpu.SMEM),   # [w_exp, head_bias]
        ],
        out_specs=pl.BlockSpec(memory_space=pltpu.VMEM),
        scratch_shapes=[
            pltpu.VMEM((L1 + 2 * PAD, 64), jnp.float32),    # padded h1: (64, 64)
            pltpu.VMEM((L2 + 2 * PAD, 128), jnp.float32),   # padded h2: (40, 128)
        ],
    )(x_pad, W1f, b1r, W2f, b2r, W3f, b3r, MeffT, exp_flat, head_scalars)
    return out.reshape(B, 1)


# ---------------------------------------------------------------------------
# Pure-JAX reference for validation
# ---------------------------------------------------------------------------
def reference_forward(inp, expv, params):
    W1, b1, W2, b2, W3, b3, W5, b5, Wlin, blin = params
    hi = jax.lax.Precision.HIGHEST

    def conv1d(x, w, b, stride, pad):
        y = jax.lax.conv_general_dilated(
            x, w, window_strides=(stride,), padding=[(pad, pad)],
            dimension_numbers=("NCH", "OIH", "NCH"), precision=hi)
        return y + b[None, :, None]

    def in_lrelu(x):
        m = jnp.mean(x, axis=-1, keepdims=True)
        v = jnp.mean((x - m) ** 2, axis=-1, keepdims=True)
        x = (x - m) / jnp.sqrt(v + EPS)
        return jnp.where(x >= 0, x, NEG_SLOPE * x)

    h = in_lrelu(conv1d(inp, W1, b1, 2, 1))
    h = in_lrelu(conv1d(h, W2, b2, 2, 1))
    h = in_lrelu(conv1d(h, W3, b3, 2, 1))
    h = conv1d(h, W5, b5, 1, 0)
    B = inp.shape[0]
    flat = jnp.concatenate([h.reshape(B, -1), expv.reshape(B, -1)], axis=1)
    return jax.nn.sigmoid(jnp.dot(flat, Wlin.T, precision=hi) + blin)


if __name__ == "__main__":
    # Linear(64*9 + 1, 1) forces block5 output length 9 => input length 96.
    B, C_in, L = 2, 4, 96
    key = jax.random.PRNGKey(0)
    ks = jax.random.split(key, 12)
    s = 0.05
    W1 = jax.random.normal(ks[0], (64, C_in, 4), jnp.float32) * s
    b1 = jax.random.normal(ks[1], (64,), jnp.float32) * s
    W2 = jax.random.normal(ks[2], (128, 64, 4), jnp.float32) * s
    b2 = jax.random.normal(ks[3], (128,), jnp.float32) * s
    W3 = jax.random.normal(ks[4], (256, 128, 4), jnp.float32) * s
    b3 = jax.random.normal(ks[5], (256,), jnp.float32) * s
    W5 = jax.random.normal(ks[6], (64, 256, 4), jnp.float32) * s
    b5 = jax.random.normal(ks[7], (64,), jnp.float32) * s
    Wlin = jax.random.normal(ks[8], (1, 64 * 9 + 1), jnp.float32) * s
    blin = jax.random.normal(ks[9], (1,), jnp.float32) * s
    inp = jax.random.normal(ks[10], (B, C_in, L), jnp.float32)
    expv = jax.random.normal(ks[11], (B, 1), jnp.float32)
    params = (W1, b1, W2, b2, W3, b3, W5, b5, Wlin, blin)

    fwd = jax.jit(discriminator_forward)
    out = jax.block_until_ready(fwd(inp, expv, params))
    ref = reference_forward(inp, expv, params)
    assert out.shape == (B, 1), out.shape
    err = float(jnp.max(jnp.abs(out - ref)))
    assert err < 2e-2, f"mismatch vs reference: {err}"
    print("KERNEL_OK")
</pallas_src>

<mosaic_0001>
module attributes {stable_mosaic.version = 11 : i64} {
  func.func @kernel(%arg0: memref<196x4xf32, #tpu.memory_space<vmem>>, %arg1: memref<16x64xbf16, #tpu.memory_space<vmem>>, %arg2: memref<1x64xf32, #tpu.memory_space<vmem>>, %arg3: memref<256x128xbf16, #tpu.memory_space<vmem>>, %arg4: memref<1x128xf32, #tpu.memory_space<vmem>>, %arg5: memref<512x256xbf16, #tpu.memory_space<vmem>>, %arg6: memref<1x256xf32, #tpu.memory_space<vmem>>, %arg7: memref<12x256xf32, #tpu.memory_space<vmem>>, %arg8: memref<2xf32, #tpu.memory_space<smem>>, %arg9: memref<2xf32, #tpu.memory_space<smem>>, %arg10: memref<1x2xf32, #tpu.memory_space<vmem>>, %arg11: memref<64x64xf32, #tpu.memory_space<vmem>>, %arg12: memref<40x128xf32, #tpu.memory_space<vmem>>) attributes {dimension_semantics = [], scalar_prefetch = 0 : i64, scratch_operands = 2 : i64, tpu.core_type = #tpu.core_type<tc>} {
    %cst = arith.constant 0.000000e+00 : f32
    %0 = vector.broadcast %cst : f32 to vector<64x64xf32>
    %c0 = arith.constant 0 : index
    %c0_0 = arith.constant 0 : index
    %1 = vector.load %arg11[%c0, %c0_0] : memref<64x64xf32, #tpu.memory_space<vmem>>, vector<64x64xf32>
    tpu.vector_store %arg11[%c0, %c0_0], %0 {strides = array<i32>} : memref<64x64xf32, #tpu.memory_space<vmem>>, vector<64x64xf32>,
    %cst_1 = arith.constant 0.000000e+00 : f32
    %2 = vector.broadcast %cst_1 : f32 to vector<40x128xf32>
    %c0_2 = arith.constant 0 : index
    %c0_3 = arith.constant 0 : index
    %3 = vector.load %arg12[%c0_2, %c0_3] : memref<40x128xf32, #tpu.memory_space<vmem>>, vector<40x128xf32>
    tpu.vector_store %arg12[%c0_2, %c0_3], %2 {strides = array<i32>} : memref<40x128xf32, #tpu.memory_space<vmem>>, vector<40x128xf32>,
    %c0_4 = arith.constant 0 : index
    %c0_5 = arith.constant 0 : index
    %4 = tpu.strided_load %arg0[%c0_4, %c0_5] {strides = array<i32: 2, 1>} : memref<196x4xf32, #tpu.memory_space<vmem>>, vector<48x4xf32>
    %c1 = arith.constant 1 : index
    %c0_6 = arith.constant 0 : index
    %5 = tpu.strided_load %arg0[%c1, %c0_6] {strides = array<i32: 2, 1>} : memref<196x4xf32, #tpu.memory_space<vmem>>, vector<48x4xf32>
    %c2 = arith.constant 2 : index
    %c0_7 = arith.constant 0 : index
    %6 = tpu.strided_load %arg0[%c2, %c0_7] {strides = array<i32: 2, 1>} : memref<196x4xf32, #tpu.memory_space<vmem>>, vector<48x4xf32>
    %c3 = arith.constant 3 : index
    %c0_8 = arith.constant 0 : index
    %7 = tpu.strided_load %arg0[%c3, %c0_8] {strides = array<i32: 2, 1>} : memref<196x4xf32, #tpu.memory_space<vmem>>, vector<48x4xf32>
    %8 = tpu.concatenate %4, %5, %6, %7 in 1 : vector<48x4xf32>, vector<48x4xf32>, vector<48x4xf32>, vector<48x4xf32> -> vector<48x16xf32>
    %9 = arith.truncf %8 : vector<48x16xf32> to vector<48x16xbf16>
    %c0_9 = arith.constant 0 : index
    %c0_10 = arith.constant 0 : index
    %10 = vector.load %arg1[%c0_9, %c0_10] : memref<16x64xbf16, #tpu.memory_space<vmem>>, vector<16x64xbf16>
    %cst_11 = arith.constant dense<0.000000e+00> : vector<48x64xf32>
    %11 = tpu.matmul %9, %10, %cst_11 {dimension_numbers = #tpu.dot_dimension_numbers<[1], [0], [0], [1], [0, 0, 1, 1], [], []>} : vector<48x16xbf16>, vector<16x64xbf16>, vector<48x64xf32> -> vector<48x64xf32>
    %c0_12 = arith.constant 0 : index
    %c0_13 = arith.constant 0 : index
    %12 = vector.load %arg2[%c0_12, %c0_13] : memref<1x64xf32, #tpu.memory_space<vmem>>, vector<1x64xf32>
    %13 = vector.broadcast %12 : vector<1x64xf32> to vector<48x64xf32>
    %14 = arith.addf %11, %13 : vector<48x64xf32>
    %cst_14 = arith.constant dense<0.000000e+00> : vector<64xf32>
    %15 = vector.multi_reduction <add>, %14, %cst_14 [0] : vector<48x64xf32> to vector<64xf32>
    %16 = vector.shape_cast %15 : vector<64xf32> to vector<1x64xf32>
    %cst_15 = arith.constant 4.800000e+01 : f32
    %17 = vector.broadcast %cst_15 : f32 to vector<1x64xf32>
    %18 = arith.divf %16, %17 : vector<1x64xf32>
    %19 = vector.broadcast %18 : vector<1x64xf32> to vector<48x64xf32>
    %20 = arith.subf %14, %19 : vector<48x64xf32>
    %21 = arith.mulf %20, %20 : vector<48x64xf32>
    %cst_16 = arith.constant dense<0.000000e+00> : vector<64xf32>
    %22 = vector.multi_reduction <add>, %21, %cst_16 [0] : vector<48x64xf32> to vector<64xf32>
    %23 = vector.shape_cast %22 : vector<64xf32> to vector<1x64xf32>
    %cst_17 = arith.constant 4.800000e+01 : f32
    %24 = vector.broadcast %cst_17 : f32 to vector<1x64xf32>
    %25 = arith.divf %23, %24 : vector<1x64xf32>
    %cst_18 = arith.constant 9.99999974E-6 : f32
    %26 = vector.broadcast %cst_18 : f32 to vector<1x64xf32>
    %27 = arith.addf %25, %26 : vector<1x64xf32>
    %28 = math.rsqrt %27 : vector<1x64xf32>
    %29 = vector.broadcast %28 : vector<1x64xf32> to vector<48x64xf32>
    %30 = arith.mulf %20, %29 : vector<48x64xf32>
    %cst_19 = arith.constant 0.000000e+00 : f32
    %31 = vector.broadcast %cst_19 : f32 to vector<48x64xf32>
    %32 = arith.cmpf oge, %30, %31 : vector<48x64xf32>
    %cst_20 = arith.constant 2.000000e-01 : f32
    %33 = vector.broadcast %cst_20 : f32 to vector<48x64xf32>
    %34 = arith.mulf %33, %30 : vector<48x64xf32>
    %35 = arith.select %32, %30, %34 : vector<48x64xi1>, vector<48x64xf32>
    %c8 = arith.constant 8 : index
    %c0_21 = arith.constant 0 : index
    %36 = vector.load %arg11[%c8, %c0_21] : memref<64x64xf32, #tpu.memory_space<vmem>>, vector<48x64xf32>
    tpu.vector_store %arg11[%c8, %c0_21], %35 {strides = array<i32>} : memref<64x64xf32, #tpu.memory_space<vmem>>, vector<48x64xf32>,
    %c7 = arith.constant 7 : index
    %c0_22 = arith.constant 0 : index
    %37 = tpu.strided_load %arg11[%c7, %c0_22] {strides = array<i32: 2, 1>} : memref<64x64xf32, #tpu.memory_space<vmem>>, vector<24x64xf32>
    %c8_23 = arith.constant 8 : index
    %c0_24 = arith.constant 0 : index
    %38 = tpu.strided_load %arg11[%c8_23, %c0_24] {strides = array<i32: 2, 1>} : memref<64x64xf32, #tpu.memory_space<vmem>>, vector<24x64xf32>
    %c9 = arith.constant 9 : index
    %c0_25 = arith.constant 0 : index
    %39 = tpu.strided_load %arg11[%c9, %c0_25] {strides = array<i32: 2, 1>} : memref<64x64xf32, #tpu.memory_space<vmem>>, vector<24x64xf32>
    %c10 = arith.constant 10 : index
    %c0_26 = arith.constant 0 : index
    %40 = tpu.strided_load %arg11[%c10, %c0_26] {strides = array<i32: 2, 1>} : memref<64x64xf32, #tpu.memory_space<vmem>>, vector<24x64xf32>
    %41 = tpu.concatenate %37, %38, %39, %40 in 1 : vector<24x64xf32>, vector<24x64xf32>, vector<24x64xf32>, vector<24x64xf32> -> vector<24x256xf32>
    %42 = arith.truncf %41 : vector<24x256xf32> to vector<24x256xbf16>
    %c0_27 = arith.constant 0 : index
    %c0_28 = arith.constant 0 : index
    %43 = vector.load %arg3[%c0_27, %c0_28] : memref<256x128xbf16, #tpu.memory_space<vmem>>, vector<256x128xbf16>
    %cst_29 = arith.constant dense<0.000000e+00> : vector<24x128xf32>
    %44 = tpu.matmul %42, %43, %cst_29 {dimension_numbers = #tpu.dot_dimension_numbers<[1], [0], [0], [1], [0, 0, 1, 1], [], []>} : vector<24x256xbf16>, vector<256x128xbf16>, vector<24x128xf32> -> vector<24x128xf32>
    %c0_30 = arith.constant 0 : index
    %c0_31 = arith.constant 0 : index
    %45 = vector.load %arg4[%c0_30, %c0_31] : memref<1x128xf32, #tpu.memory_space<vmem>>, vector<1x128xf32>
    %46 = vector.broadcast %45 : vector<1x128xf32> to vector<24x128xf32>
    %47 = arith.addf %44, %46 : vector<24x128xf32>
    %cst_32 = arith.constant dense<0.000000e+00> : vector<128xf32>
    %48 = vector.multi_reduction <add>, %47, %cst_32 [0] : vector<24x128xf32> to vector<128xf32>
    %49 = vector.shape_cast %48 : vector<128xf32> to vector<1x128xf32>
    %cst_33 = arith.constant 2.400000e+01 : f32
    %50 = vector.broadcast %cst_33 : f32 to vector<1x128xf32>
    %51 = arith.divf %49, %50 : vector<1x128xf32>
    %52 = vector.broadcast %51 : vector<1x128xf32> to vector<24x128xf32>
    %53 = arith.subf %47, %52 : vector<24x128xf32>
    %54 = arith.mulf %53, %53 : vector<24x128xf32>
    %cst_34 = arith.constant dense<0.000000e+00> : vector<128xf32>
    %55 = vector.multi_reduction <add>, %54, %cst_34 [0] : vector<24x128xf32> to vector<128xf32>
    %56 = vector.shape_cast %55 : vector<128xf32> to vector<1x128xf32>
    %cst_35 = arith.constant 2.400000e+01 : f32
    %57 = vector.broadcast %cst_35 : f32 to vector<1x128xf32>
    %58 = arith.divf %56, %57 : vector<1x128xf32>
    %cst_36 = arith.constant 9.99999974E-6 : f32
    %59 = vector.broadcast %cst_36 : f32 to vector<1x128xf32>
    %60 = arith.addf %58, %59 : vector<1x128xf32>
    %61 = math.rsqrt %60 : vector<1x128xf32>
    %62 = vector.broadcast %61 : vector<1x128xf32> to vector<24x128xf32>
    %63 = arith.mulf %53, %62 : vector<24x128xf32>
    %cst_37 = arith.constant 0.000000e+00 : f32
    %64 = vector.broadcast %cst_37 : f32 to vector<24x128xf32>
    %65 = arith.cmpf oge, %63, %64 : vector<24x128xf32>
    %cst_38 = arith.constant 2.000000e-01 : f32
    %66 = vector.broadcast %cst_38 : f32 to vector<24x128xf32>
    %67 = arith.mulf %66, %63 : vector<24x128xf32>
    %68 = arith.select %65, %63, %67 : vector<24x128xi1>, vector<24x128xf32>
    %c8_39 = arith.constant 8 : index
    %c0_40 = arith.constant 0 : index
    %69 = vector.load %arg12[%c8_39, %c0_40] : memref<40x128xf32, #tpu.memory_space<vmem>>, vector<24x128xf32>
    tpu.vector_store %arg12[%c8_39, %c0_40], %68 {strides = array<i32>} : memref<40x128xf32, #tpu.memory_space<vmem>>, vector<24x128xf32>,
    %c7_41 = arith.constant 7 : index
    %c0_42 = arith.constant 0 : index
    %70 = tpu.strided_load %arg12[%c7_41, %c0_42] {strides = array<i32: 2, 1>} : memref<40x128xf32, #tpu.memory_space<vmem>>, vector<12x128xf32>
    %c8_43 = arith.constant 8 : index
    %c0_44 = arith.constant 0 : index
    %71 = tpu.strided_load %arg12[%c8_43, %c0_44] {strides = array<i32: 2, 1>} : memref<40x128xf32, #tpu.memory_space<vmem>>, vector<12x128xf32>
    %c9_45 = arith.constant 9 : index
    %c0_46 = arith.constant 0 : index
    %72 = tpu.strided_load %arg12[%c9_45, %c0_46] {strides = array<i32: 2, 1>} : memref<40x128xf32, #tpu.memory_space<vmem>>, vector<12x128xf32>
    %c10_47 = arith.constant 10 : index
    %c0_48 = arith.constant 0 : index
    %73 = tpu.strided_load %arg12[%c10_47, %c0_48] {strides = array<i32: 2, 1>} : memref<40x128xf32, #tpu.memory_space<vmem>>, vector<12x128xf32>
    %74 = tpu.concatenate %70, %71, %72, %73 in 1 : vector<12x128xf32>, vector<12x128xf32>, vector<12x128xf32>, vector<12x128xf32> -> vector<12x512xf32>
    %75 = arith.truncf %74 : vector<12x512xf32> to vector<12x512xbf16>
    %c0_49 = arith.constant 0 : index
    %c0_50 = arith.constant 0 : index
    %76 = vector.load %arg5[%c0_49, %c0_50] : memref<512x256xbf16, #tpu.memory_space<vmem>>, vector<512x256xbf16>
    %cst_51 = arith.constant dense<0.000000e+00> : vector<12x256xf32>
    %77 = tpu.matmul %75, %76, %cst_51 {dimension_numbers = #tpu.dot_dimension_numbers<[1], [0], [0], [1], [0, 0, 1, 1], [], []>} : vector<12x512xbf16>, vector<512x256xbf16>, vector<12x256xf32> -> vector<12x256xf32>
    %c0_52 = arith.constant 0 : index
    %c0_53 = arith.constant 0 : index
    %78 = vector.load %arg6[%c0_52, %c0_53] : memref<1x256xf32, #tpu.memory_space<vmem>>, vector<1x256xf32>
    %79 = vector.broadcast %78 : vector<1x256xf32> to vector<12x256xf32>
    %80 = arith.addf %77, %79 : vector<12x256xf32>
    %cst_54 = arith.constant dense<0.000000e+00> : vector<256xf32>
    %81 = vector.multi_reduction <add>, %80, %cst_54 [0] : vector<12x256xf32> to vector<256xf32>
    %82 = vector.shape_cast %81 : vector<256xf32> to vector<1x256xf32>
    %cst_55 = arith.constant 1.200000e+01 : f32
    %83 = vector.broadcast %cst_55 : f32 to vector<1x256xf32>
    %84 = arith.divf %82, %83 : vector<1x256xf32>
    %85 = vector.broadcast %84 : vector<1x256xf32> to vector<12x256xf32>
    %86 = arith.subf %80, %85 : vector<12x256xf32>
    %87 = arith.mulf %86, %86 : vector<12x256xf32>
    %cst_56 = arith.constant dense<0.000000e+00> : vector<256xf32>
    %88 = vector.multi_reduction <add>, %87, %cst_56 [0] : vector<12x256xf32> to vector<256xf32>
    %89 = vector.shape_cast %88 : vector<256xf32> to vector<1x256xf32>
    %cst_57 = arith.constant 1.200000e+01 : f32
    %90 = vector.broadcast %cst_57 : f32 to vector<1x256xf32>
    %91 = arith.divf %89, %90 : vector<1x256xf32>
    %cst_58 = arith.constant 9.99999974E-6 : f32
    %92 = vector.broadcast %cst_58 : f32 to vector<1x256xf32>
    %93 = arith.addf %91, %92 : vector<1x256xf32>
    %94 = math.rsqrt %93 : vector<1x256xf32>
    %95 = vector.broadcast %94 : vector<1x256xf32> to vector<12x256xf32>
    %96 = arith.mulf %86, %95 : vector<12x256xf32>
    %cst_59 = arith.constant 0.000000e+00 : f32
    %97 = vector.broadcast %cst_59 : f32 to vector<12x256xf32>
    %98 = arith.cmpf oge, %96, %97 : vector<12x256xf32>
    %cst_60 = arith.constant 2.000000e-01 : f32
    %99 = vector.broadcast %cst_60 : f32 to vector<12x256xf32>
    %100 = arith.mulf %99, %96 : vector<12x256xf32>
    %101 = arith.select %98, %96, %100 : vector<12x256xi1>, vector<12x256xf32>
    %c0_61 = arith.constant 0 : index
    %c0_62 = arith.constant 0 : index
    %102 = vector.load %arg7[%c0_61, %c0_62] : memref<12x256xf32, #tpu.memory_space<vmem>>, vector<12x256xf32>
    %103 = arith.mulf %101, %102 : vector<12x256xf32>
    %104 = vector.shape_cast %103 : vector<12x256xf32> to vector<1x12x256xf32>
    %cst_63 = arith.constant dense<0.000000e+00> : vector<1xf32>
    %105 = vector.multi_reduction <add>, %104, %cst_63 [1, 2] : vector<1x12x256xf32> to vector<1xf32>
    %106 = vector.shape_cast %105 : vector<1xf32> to vector<1x1x1xf32>
    %107 = vector.extract %106[0, 0, 0] : f32 from vector<1x1x1xf32>
    %108 = vector.broadcast %107 : f32 to vector<1x1xf32>
    %c0_64 = arith.constant 0 : index
    %109 = memref.load %arg9[%c0_64] : memref<2xf32, #tpu.memory_space<smem>>
    %c0_65 = arith.constant 0 : index
    %110 = memref.load %arg8[%c0_65] : memref<2xf32, #tpu.memory_space<smem>>
    %111 = arith.mulf %109, %110 : f32
    %112 = vector.broadcast %111 : f32 to vector<1x1xf32>
    %113 = arith.addf %108, %112 : vector<1x1xf32>
    %c1_66 = arith.constant 1 : index
    %114 = memref.load %arg9[%c1_66] : memref<2xf32, #tpu.memory_space<smem>>
    %115 = vector.broadcast %114 : f32 to vector<1x1xf32>
    %116 = arith.addf %113, %115 : vector<1x1xf32>
    %c98 = arith.constant 98 : index
    %c0_67 = arith.constant 0 : index
    %117 = tpu.strided_load %arg0[%c98, %c0_67] {strides = array<i32: 2, 1>} : memref<196x4xf32, #tpu.memory_space<vmem>>, vector<48x4xf32>
    %c99 = arith.constant 99 : index
    %c0_68 = arith.constant 0 : index
    %118 = tpu.strided_load %arg0[%c99, %c0_68] {strides = array<i32: 2, 1>} : memref<196x4xf32, #tpu.memory_space<vmem>>, vector<48x4xf32>
    %c100 = arith.constant 100 : index
    %c0_69 = arith.constant 0 : index
    %119 = tpu.strided_load %arg0[%c100, %c0_69] {strides = array<i32: 2, 1>} : memref<196x4xf32, #tpu.memory_space<vmem>>, vector<48x4xf32>
    %c101 = arith.constant 101 : index
    %c0_70 = arith.constant 0 : index
    %120 = tpu.strided_load %arg0[%c101, %c0_70] {strides = array<i32: 2, 1>} : memref<196x4xf32, #tpu.memory_space<vmem>>, vector<48x4xf32>
    %121 = tpu.concatenate %117, %118, %119, %120 in 1 : vector<48x4xf32>, vector<48x4xf32>, vector<48x4xf32>, vector<48x4xf32> -> vector<48x16xf32>
    %122 = arith.truncf %121 : vector<48x16xf32> to vector<48x16xbf16>
    %c0_71 = arith.constant 0 : index
    %c0_72 = arith.constant 0 : index
    %123 = vector.load %arg1[%c0_71, %c0_72] : memref<16x64xbf16, #tpu.memory_space<vmem>>, vector<16x64xbf16>
    %cst_73 = arith.constant dense<0.000000e+00> : vector<48x64xf32>
    %124 = tpu.matmul %122, %123, %cst_73 {dimension_numbers = #tpu.dot_dimension_numbers<[1], [0], [0], [1], [0, 0, 1, 1], [], []>} : vector<48x16xbf16>, vector<16x64xbf16>, vector<48x64xf32> -> vector<48x64xf32>
    %c0_74 = arith.constant 0 : index
    %c0_75 = arith.constant 0 : index
    %125 = vector.load %arg2[%c0_74, %c0_75] : memref<1x64xf32, #tpu.memory_space<vmem>>, vector<1x64xf32>
    %126 = vector.broadcast %125 : vector<1x64xf32> to vector<48x64xf32>
    %127 = arith.addf %124, %126 : vector<48x64xf32>
    %cst_76 = arith.constant dense<0.000000e+00> : vector<64xf32>
    %128 = vector.multi_reduction <add>, %127, %cst_76 [0] : vector<48x64xf32> to vector<64xf32>
    %129 = vector.shape_cast %128 : vector<64xf32> to vector<1x64xf32>
    %cst_77 = arith.constant 4.800000e+01 : f32
    %130 = vector.broadcast %cst_77 : f32 to vector<1x64xf32>
    %131 = arith.divf %129, %130 : vector<1x64xf32>
    %132 = vector.broadcast %131 : vector<1x64xf32> to vector<48x64xf32>
    %133 = arith.subf %127, %132 : vector<48x64xf32>
    %134 = arith.mulf %133, %133 : vector<48x64xf32>
    %cst_78 = arith.constant dense<0.000000e+00> : vector<64xf32>
    %135 = vector.multi_reduction <add>, %134, %cst_78 [0] : vector<48x64xf32> to vector<64xf32>
    %136 = vector.shape_cast %135 : vector<64xf32> to vector<1x64xf32>
    %cst_79 = arith.constant 4.800000e+01 : f32
    %137 = vector.broadcast %cst_79 : f32 to vector<1x64xf32>
    %138 = arith.divf %136, %137 : vector<1x64xf32>
    %cst_80 = arith.constant 9.99999974E-6 : f32
    %139 = vector.broadcast %cst_80 : f32 to vector<1x64xf32>
    %140 = arith.addf %138, %139 : vector<1x64xf32>
    %141 = math.rsqrt %140 : vector<1x64xf32>
    %142 = vector.broadcast %141 : vector<1x64xf32> to vector<48x64xf32>
    %143 = arith.mulf %133, %142 : vector<48x64xf32>
    %cst_81 = arith.constant 0.000000e+00 : f32
    %144 = vector.broadcast %cst_81 : f32 to vector<48x64xf32>
    %145 = arith.cmpf oge, %143, %144 : vector<48x64xf32>
    %cst_82 = arith.constant 2.000000e-01 : f32
    %146 = vector.broadcast %cst_82 : f32 to vector<48x64xf32>
    %147 = arith.mulf %146, %143 : vector<48x64xf32>
    %148 = arith.select %145, %143, %147 : vector<48x64xi1>, vector<48x64xf32>
    %c8_83 = arith.constant 8 : index
    %c0_84 = arith.constant 0 : index
    %149 = vector.load %arg11[%c8_83, %c0_84] : memref<64x64xf32, #tpu.memory_space<vmem>>, vector<48x64xf32>
    tpu.vector_store %arg11[%c8_83, %c0_84], %148 {strides = array<i32>} : memref<64x64xf32, #tpu.memory_space<vmem>>, vector<48x64xf32>,
    %c7_85 = arith.constant 7 : index
    %c0_86 = arith.constant 0 : index
    %150 = tpu.strided_load %arg11[%c7_85, %c0_86] {strides = array<i32: 2, 1>} : memref<64x64xf32, #tpu.memory_space<vmem>>, vector<24x64xf32>
    %c8_87 = arith.constant 8 : index
    %c0_88 = arith.constant 0 : index
    %151 = tpu.strided_load %arg11[%c8_87, %c0_88] {strides = array<i32: 2, 1>} : memref<64x64xf32, #tpu.memory_space<vmem>>, vector<24x64xf32>
    %c9_89 = arith.constant 9 : index
    %c0_90 = arith.constant 0 : index
    %152 = tpu.strided_load %arg11[%c9_89, %c0_90] {strides = array<i32: 2, 1>} : memref<64x64xf32, #tpu.memory_space<vmem>>, vector<24x64xf32>
    %c10_91 = arith.constant 10 : index
    %c0_92 = arith.constant 0 : index
    %153 = tpu.strided_load %arg11[%c10_91, %c0_92] {strides = array<i32: 2, 1>} : memref<64x64xf32, #tpu.memory_space<vmem>>, vector<24x64xf32>
    %154 = tpu.concatenate %150, %151, %152, %153 in 1 : vector<24x64xf32>, vector<24x64xf32>, vector<24x64xf32>, vector<24x64xf32> -> vector<24x256xf32>
    %155 = arith.truncf %154 : vector<24x256xf32> to vector<24x256xbf16>
    %c0_93 = arith.constant 0 : index
    %c0_94 = arith.constant 0 : index
    %156 = vector.load %arg3[%c0_93, %c0_94] : memref<256x128xbf16, #tpu.memory_space<vmem>>, vector<256x128xbf16>
    %cst_95 = arith.constant dense<0.000000e+00> : vector<24x128xf32>
    %157 = tpu.matmul %155, %156, %cst_95 {dimension_numbers = #tpu.dot_dimension_numbers<[1], [0], [0], [1], [0, 0, 1, 1], [], []>} : vector<24x256xbf16>, vector<256x128xbf16>, vector<24x128xf32> -> vector<24x128xf32>
    %c0_96 = arith.constant 0 : index
    %c0_97 = arith.constant 0 : index
    %158 = vector.load %arg4[%c0_96, %c0_97] : memref<1x128xf32, #tpu.memory_space<vmem>>, vector<1x128xf32>
    %159 = vector.broadcast %158 : vector<1x128xf32> to vector<24x128xf32>
    %160 = arith.addf %157, %159 : vector<24x128xf32>
    %cst_98 = arith.constant dense<0.000000e+00> : vector<128xf32>
    %161 = vector.multi_reduction <add>, %160, %cst_98 [0] : vector<24x128xf32> to vector<128xf32>
    %162 = vector.shape_cast %161 : vector<128xf32> to vector<1x128xf32>
    %cst_99 = arith.constant 2.400000e+01 : f32
    %163 = vector.broadcast %cst_99 : f32 to vector<1x128xf32>
    %164 = arith.divf %162, %163 : vector<1x128xf32>
    %165 = vector.broadcast %164 : vector<1x128xf32> to vector<24x128xf32>
    %166 = arith.subf %160, %165 : vector<24x128xf32>
    %167 = arith.mulf %166, %166 : vector<24x128xf32>
    %cst_100 = arith.constant dense<0.000000e+00> : vector<128xf32>
    %168 = vector.multi_reduction <add>, %167, %cst_100 [0] : vector<24x128xf32> to vector<128xf32>
    %169 = vector.shape_cast %168 : vector<128xf32> to vector<1x128xf32>
    %cst_101 = arith.constant 2.400000e+01 : f32
    %170 = vector.broadcast %cst_101 : f32 to vector<1x128xf32>
    %171 = arith.divf %169, %170 : vector<1x128xf32>
    %cst_102 = arith.constant 9.99999974E-6 : f32
    %172 = vector.broadcast %cst_102 : f32 to vector<1x128xf32>
    %173 = arith.addf %171, %172 : vector<1x128xf32>
    %174 = math.rsqrt %173 : vector<1x128xf32>
    %175 = vector.broadcast %174 : vector<1x128xf32> to vector<24x128xf32>
    %176 = arith.mulf %166, %175 : vector<24x128xf32>
    %cst_103 = arith.constant 0.000000e+00 : f32
    %177 = vector.broadcast %cst_103 : f32 to vector<24x128xf32>
    %178 = arith.cmpf oge, %176, %177 : vector<24x128xf32>
    %cst_104 = arith.constant 2.000000e-01 : f32
    %179 = vector.broadcast %cst_104 : f32 to vector<24x128xf32>
    %180 = arith.mulf %179, %176 : vector<24x128xf32>
    %181 = arith.select %178, %176, %180 : vector<24x128xi1>, vector<24x128xf32>
    %c8_105 = arith.constant 8 : index
    %c0_106 = arith.constant 0 : index
    %182 = vector.load %arg12[%c8_105, %c0_106] : memref<40x128xf32, #tpu.memory_space<vmem>>, vector<24x128xf32>
    tpu.vector_store %arg12[%c8_105, %c0_106], %181 {strides = array<i32>} : memref<40x128xf32, #tpu.memory_space<vmem>>, vector<24x128xf32>,
    %c7_107 = arith.constant 7 : index
    %c0_108 = arith.constant 0 : index
    %183 = tpu.strided_load %arg12[%c7_107, %c0_108] {strides = array<i32: 2, 1>} : memref<40x128xf32, #tpu.memory_space<vmem>>, vector<12x128xf32>
    %c8_109 = arith.constant 8 : index
    %c0_110 = arith.constant 0 : index
    %184 = tpu.strided_load %arg12[%c8_109, %c0_110] {strides = array<i32: 2, 1>} : memref<40x128xf32, #tpu.memory_space<vmem>>, vector<12x128xf32>
    %c9_111 = arith.constant 9 : index
    %c0_112 = arith.constant 0 : index
    %185 = tpu.strided_load %arg12[%c9_111, %c0_112] {strides = array<i32: 2, 1>} : memref<40x128xf32, #tpu.memory_space<vmem>>, vector<12x128xf32>
    %c10_113 = arith.constant 10 : index
    %c0_114 = arith.constant 0 : index
    %186 = tpu.strided_load %arg12[%c10_113, %c0_114] {strides = array<i32: 2, 1>} : memref<40x128xf32, #tpu.memory_space<vmem>>, vector<12x128xf32>
    %187 = tpu.concatenate %183, %184, %185, %186 in 1 : vector<12x128xf32>, vector<12x128xf32>, vector<12x128xf32>, vector<12x128xf32> -> vector<12x512xf32>
    %188 = arith.truncf %187 : vector<12x512xf32> to vector<12x512xbf16>
    %c0_115 = arith.constant 0 : index
    %c0_116 = arith.constant 0 : index
    %189 = vector.load %arg5[%c0_115, %c0_116] : memref<512x256xbf16, #tpu.memory_space<vmem>>, vector<512x256xbf16>
    %cst_117 = arith.constant dense<0.000000e+00> : vector<12x256xf32>
    %190 = tpu.matmul %188, %189, %cst_117 {dimension_numbers = #tpu.dot_dimension_numbers<[1], [0], [0], [1], [0, 0, 1, 1], [], []>} : vector<12x512xbf16>, vector<512x256xbf16>, vector<12x256xf32> -> vector<12x256xf32>
    %c0_118 = arith.constant 0 : index
    %c0_119 = arith.constant 0 : index
    %191 = vector.load %arg6[%c0_118, %c0_119] : memref<1x256xf32, #tpu.memory_space<vmem>>, vector<1x256xf32>
    %192 = vector.broadcast %191 : vector<1x256xf32> to vector<12x256xf32>
    %193 = arith.addf %190, %192 : vector<12x256xf32>
    %cst_120 = arith.constant dense<0.000000e+00> : vector<256xf32>
    %194 = vector.multi_reduction <add>, %193, %cst_120 [0] : vector<12x256xf32> to vector<256xf32>
    %195 = vector.shape_cast %194 : vector<256xf32> to vector<1x256xf32>
    %cst_121 = arith.constant 1.200000e+01 : f32
    %196 = vector.broadcast %cst_121 : f32 to vector<1x256xf32>
    %197 = arith.divf %195, %196 : vector<1x256xf32>
    %198 = vector.broadcast %197 : vector<1x256xf32> to vector<12x256xf32>
    %199 = arith.subf %193, %198 : vector<12x256xf32>
    %200 = arith.mulf %199, %199 : vector<12x256xf32>
    %cst_122 = arith.constant dense<0.000000e+00> : vector<256xf32>
    %201 = vector.multi_reduction <add>, %200, %cst_122 [0] : vector<12x256xf32> to vector<256xf32>
    %202 = vector.shape_cast %201 : vector<256xf32> to vector<1x256xf32>
    %cst_123 = arith.constant 1.200000e+01 : f32
    %203 = vector.broadcast %cst_123 : f32 to vector<1x256xf32>
    %204 = arith.divf %202, %203 : vector<1x256xf32>
    %cst_124 = arith.constant 9.99999974E-6 : f32
    %205 = vector.broadcast %cst_124 : f32 to vector<1x256xf32>
    %206 = arith.addf %204, %205 : vector<1x256xf32>
    %207 = math.rsqrt %206 : vector<1x256xf32>
    %208 = vector.broadcast %207 : vector<1x256xf32> to vector<12x256xf32>
    %209 = arith.mulf %199, %208 : vector<12x256xf32>
    %cst_125 = arith.constant 0.000000e+00 : f32
    %210 = vector.broadcast %cst_125 : f32 to vector<12x256xf32>
    %211 = arith.cmpf oge, %209, %210 : vector<12x256xf32>
    %cst_126 = arith.constant 2.000000e-01 : f32
    %212 = vector.broadcast %cst_126 : f32 to vector<12x256xf32>
    %213 = arith.mulf %212, %209 : vector<12x256xf32>
    %214 = arith.select %211, %209, %213 : vector<12x256xi1>, vector<12x256xf32>
    %c0_127 = arith.constant 0 : index
    %c0_128 = arith.constant 0 : index
    %215 = vector.load %arg7[%c0_127, %c0_128] : memref<12x256xf32, #tpu.memory_space<vmem>>, vector<12x256xf32>
    %216 = arith.mulf %214, %215 : vector<12x256xf32>
    %217 = vector.shape_cast %216 : vector<12x256xf32> to vector<1x12x256xf32>
    %cst_129 = arith.constant dense<0.000000e+00> : vector<1xf32>
    %218 = vector.multi_reduction <add>, %217, %cst_129 [1, 2] : vector<1x12x256xf32> to vector<1xf32>
    %219 = vector.shape_cast %218 : vector<1xf32> to vector<1x1x1xf32>
    %220 = vector.extract %219[0, 0, 0] : f32 from vector<1x1x1xf32>
    %221 = vector.broadcast %220 : f32 to vector<1x1xf32>
    %c0_130 = arith.constant 0 : index
    %222 = memref.load %arg9[%c0_130] : memref<2xf32, #tpu.memory_space<smem>>
    %c1_131 = arith.constant 1 : index
    %223 = memref.load %arg8[%c1_131] : memref<2xf32, #tpu.memory_space<smem>>
    %224 = arith.mulf %222, %223 : f32
    %225 = vector.broadcast %224 : f32 to vector<1x1xf32>
    %226 = arith.addf %221, %225 : vector<1x1xf32>
    %c1_132 = arith.constant 1 : index
    %227 = memref.load %arg9[%c1_132] : memref<2xf32, #tpu.memory_space<smem>>
    %228 = vector.broadcast %227 : f32 to vector<1x1xf32>
    %229 = arith.addf %226, %228 : vector<1x1xf32>
    %230 = tpu.concatenate %116, %229 in 1 : vector<1x1xf32>, vector<1x1xf32> -> vector<1x2xf32>
    %cst_133 = arith.constant -3.000000e+01 : f32
    %cst_134 = arith.constant 3.000000e+01 : f32
    %231 = vector.broadcast %cst_133 : f32 to vector<1x2xf32>
    %232 = arith.maximumf %231, %230 : vector<1x2xf32>
    %233 = vector.broadcast %cst_134 : f32 to vector<1x2xf32>
    %234 = arith.minimumf %233, %232 : vector<1x2xf32>
    %cst_135 = arith.constant 0.000000e+00 : f32
    %235 = vector.broadcast %cst_135 : f32 to vector<1x2xf32>
    %236 = arith.subf %235, %234 : vector<1x2xf32>
    %237 = math.exp %236 : vector<1x2xf32>
    %cst_136 = arith.constant 1.000000e+00 : f32
    %238 = vector.broadcast %cst_136 : f32 to vector<1x2xf32>
    %239 = arith.addf %238, %237 : vector<1x2xf32>
    %cst_137 = arith.constant 1.000000e+00 : f32
    %240 = vector.broadcast %cst_137 : f32 to vector<1x2xf32>
    %241 = arith.divf %240, %239 : vector<1x2xf32>
    %c0_138 = arith.constant 0 : index
    %c0_139 = arith.constant 0 : index
    %242 = vector.load %arg10[%c0_138, %c0_139] : memref<1x2xf32, #tpu.memory_space<vmem>>, vector<1x2xf32>
    tpu.vector_store %arg10[%c0_138, %c0_139], %241 {strides = array<i32>} : memref<1x2xf32, #tpu.memory_space<vmem>>, vector<1x2xf32>,
    return
  }
}

</mosaic_0001>

<bundles_post_ra>
// kernel: squeeze.7
= control target key start
LH: loop header
LB: loop body
LE: loop exit
PB: predicated region body
PF: predicated region fallthrough
CT: control target
= control target key end

     0   :  { %s643_s10 = smov 127   ;;  %s644_s11 = smov 123   ;;  %vm409_vm0 = vcmask 982016   ;;  %vm423_vm1 = vcmask 998400   ;;  %vm437_vm2 = vcmask 1014784   ;;  %vm450_vm3 = vcmask 1031168   ;;  %s1184_s0 = inlined_call_operand.vmem [shape: f32[576], index: 0, kind: input, shape index: {}]   ;;  %s1185_s1 = inlined_call_operand.vmem [shape: f32[64,9], index: 1, kind: output, shape index: {}]  }
   0x1   :  { %v460_v0 = vld [vmem:[%s1184_s0 + $0x4] sm:$0x1]   ;;  %v464_v1 = vld [vmem:[%s1184_s0 + $0x2] sm:$0x1]   ;;  %v462_v2 = vld [vmem:[%s1184_s0 + $0x3] sm:$0x1]  }
   0x2   :  { %7 = vrot.lane.b32.xlu0 %v460_v0, %s643_s10  ;;  %21 = vrot.lane.b32.xlu1 %v464_v1, %s644_s11  ;;  %v466_v3 = vld [vmem:[%s1184_s0 + $0x1] sm:$0x1]   ;;  %s645_s16 = smov 125   ;;  %s646_s17 = smov 121   ;;  %v33_v4 = vld [vmem:[%s1184_s0] sm:$0x1]  }
   0x3   :  { %v469_v5 = vld [vmem:[%s1184_s0 + $0x4] sm:$0x1]   ;;  %s647_s22 = smov 119   ;;  %s648_s23 = smov 118   ;;  %v471_v6 = vld [vmem:[%s1184_s0 + $0x3] sm:$0x1]  }
   0x4   :  { %v473_v7 = vld [vmem:[%s1184_s0 + $0x2] sm:$0x1]   ;;  %s649_s28 = smov 116   ;;  %s650_s29 = smov 114   ;;  %v475_v8 = vld [vmem:[%s1184_s0 + $0x1] sm:$0x1]  }
   0x5   :  { %v67_v9 = vld [vmem:[%s1184_s0] sm:$0x1]   ;;  %s651_s5 = smov 112   ;;  %s652_s6 = smov 110   ;;  %v478_v10 = vld [vmem:[%s1184_s0 + $0x4] sm:$0x1]  }
   0x6   :  { %14 = vrot.lane.b32.xlu0 %v462_v2, %s645_s16  ;;  %28 = vrot.lane.b32.xlu1 %v466_v3, %s646_s17  ;;  %v480_v11 = vld [vmem:[%s1184_s0 + $0x3] sm:$0x1]   ;;  %s653_s11 = smov 109   ;;  %s654_s12 = smov 107   ;;  %v482_v12 = vld [vmem:[%s1184_s0 + $0x2] sm:$0x1]  }
   0x7   :  { %v484_v13 = vld [vmem:[%s1184_s0 + $0x1] sm:$0x1]   ;;  %s655_s17 = smov 105   ;;  %s656_s18 = smov 103   ;;  %v101_v14 = vld [vmem:[%s1184_s0] sm:$0x1]  }
   0x8   :  { %v487_v15 = vld [vmem:[%s1184_s0 + $0x4] sm:$0x1]   ;;  %s658_s24 = smov 100   ;;  %v489_v16 = vld [vmem:[%s1184_s0 + $0x3] sm:$0x1]   ;;  %s660_s30 = smov 96  }
   0x9   :  { %v491_v17 = vld [vmem:[%s1184_s0 + $0x2] sm:$0x1]   ;;  %v493_v18 = vld [vmem:[%s1184_s0 + $0x1] sm:$0x1]   ;;  %v135_v19 = vld [vmem:[%s1184_s0] sm:$0x1]  }
   0xa   :  { %34 = vrot.lane.b32.xlu0 %v33_v4, %s647_s22  ;;  %41 = vrot.lane.b32.xlu1 %v469_v5, %s648_s23  ;;  %s657_s23 = smov 101   ;;  %s662_s7 = smov 92   ;;  %v496_v20 = vld [vmem:[%s1184_s0 + $0x4] sm:$0x1]   ;;  %v498_v21 = vld [vmem:[%s1184_s0 + $0x3] sm:$0x1]  }
   0xb   :  { %s664_s13 = smov 89   ;;  %v500_v22 = vld [vmem:[%s1184_s0 + $0x2] sm:$0x1]   ;;  %v502_v23 = vld [vmem:[%s1184_s0 + $0x1] sm:$0x1]   ;;  %s666_s19 = smov 85  }
   0xc   :  { %v169_v24 = vld [vmem:[%s1184_s0] sm:$0x1]   ;;  %v505_v25 = vld [vmem:[%s1184_s0 + $0x4] sm:$0x1]   ;;  %s668_s25 = smov 82   ;;  %s670_s2 = smov 78  }
   0xd   :  { %v507_v26 = vld [vmem:[%s1184_s0 + $0x3] sm:$0x1]   ;;  %v509_v27 = vld [vmem:[%s1184_s0 + $0x2] sm:$0x1]   ;;  %v511_v28 = vld [vmem:[%s1184_s0 + $0x1] sm:$0x1]  }
   0xe   :  { %48 = vrot.lane.b32.xlu0 %v471_v6, %s649_s28  ;;  %55 = vrot.lane.b32.xlu1 %v473_v7, %s650_s29  ;;  %s659_s29 = smov 98   ;;  %v203_v29 = vld [vmem:[%s1184_s0] sm:$0x1]   ;;  %s672_s8 = smov 74   ;;  %v514_v30 = vld [vmem:[%s1184_s0 + $0x4] sm:$0x1]  }
   0xf   :  { %v516_v31 = vld [vmem:[%s1184_s0 + $0x3] sm:$0x1]   ;;  %s674_s14 = smov 71   ;;  %v518_v32 = vld [vmem:[%s1184_s0 + $0x2] sm:$0x1]   ;;  %s675_s27 = smov 69  }
  0x10   :  { %v520_v33 = vld [vmem:[%s1184_s0 + $0x1] sm:$0x1]   ;;  %v565_v34 = vld [vmem:[%s1184_s0 + $0x3] sm:$0x1]   ;;  %v566_v35 = vld [vmem:[%s1184_s0 + $0x4] sm:$0x1]  }
  0x11   :  { %v569_v36 = vld [vmem:[%s1184_s0 + $0x2] sm:$0x1]   ;;  %v570_v37 = vld [vmem:[%s1184_s0 + $0x3] sm:$0x1]   ;;  %s676_s28 = smov 67   ;;  %v410_v38 = vsel %vm409_vm0, %v566_v35, %v565_v34  ;;  %s678_s9 = smov 6  }
  0x12   :  { %62 = vrot.lane.b32.xlu0 %v475_v8, %s651_s5  ;;  %68 = vrot.lane.b32.xlu1 %v67_v9, %s652_s6  ;;  %s661_s6 = smov 94   ;;  %v424_v39 = vsel %vm423_vm1, %v570_v37, %v569_v36  ;;  %v573_v40 = vld [vmem:[%s1184_s0 + $0x1] sm:$0x1]   ;;  %v574_v41 = vld [vmem:[%s1184_s0 + $0x2] sm:$0x1]   ;;  %s679_s10 = smov 4  }
  0x13   :  { %v447_v42 = vld [vmem:[%s1184_s0] sm:$0x1]   ;;  %v577_v43 = vld [vmem:[%s1184_s0 + $0x1] sm:$0x1]   ;;  %v438_v44 = vsel %vm437_vm2, %v574_v41, %v573_v40  ;;  %v523_v47 = vld [vmem:[%s1184_s0 + $0x3] sm:$0x1]  }
  0x14   :  { %v451_v45 = vsel %vm450_vm3, %v577_v43, %v447_v42  ;;  %v237_v46 = vld [vmem:[%s1184_s0] sm:$0x1]   ;;  %s681_s16 = smov 65   ;;  %v525_v48 = vld [vmem:[%s1184_s0 + $0x2] sm:$0x1]   ;;  %s683_s22 = smov 60  }
  0x15   :  { %v527_v49 = vld [vmem:[%s1184_s0 + $0x1] sm:$0x1]   ;;  %v264_v50 = vld [vmem:[%s1184_s0] sm:$0x1]   ;;  %v530_v51 = vld [vmem:[%s1184_s0 + $0x3] sm:$0x1]  }
  0x16   :  { %75 = vrot.lane.b32.xlu0 %v478_v10, %s653_s11  ;;  %82 = vrot.lane.b32.xlu1 %v480_v11, %s654_s12  ;;  %s663_s12 = smov 91   ;;  %s680_s11 = smov 2   ;;  %v532_v52 = vld [vmem:[%s1184_s0 + $0x2] sm:$0x1]   ;;  %v534_v53 = vld [vmem:[%s1184_s0 + $0x1] sm:$0x1]  }
  0x17   :  { %s687_s5 = smov 51   ;;  %v291_v54 = vld [vmem:[%s1184_s0] sm:$0x1]   ;;  %v537_v55 = vld [vmem:[%s1184_s0 + $0x3] sm:$0x1]   ;;  %vm3_vm4 = vcmask 72704  }
  0x18   :  { %v539_v56 = vld [vmem:[%s1184_s0 + $0x2] sm:$0x1]   ;;  %v541_v57 = vld [vmem:[%s1184_s0 + $0x1] sm:$0x1]   ;;  %v318_v58 = vld [vmem:[%s1184_s0] sm:$0x1]  }
  0x19   :  { %v544_v59 = vld [vmem:[%s1184_s0 + $0x3] sm:$0x1]   ;;  %v546_v60 = vld [vmem:[%s1184_s0 + $0x2] sm:$0x1]   ;;  %v548_v61 = vld [vmem:[%s1184_s0 + $0x1] sm:$0x1]  }
  0x1a   :  { %89 = vrot.lane.b32.xlu0 %v482_v12, %s655_s17  ;;  %96 = vrot.lane.b32.xlu1 %v484_v13, %s656_s18  ;;  %s665_s18 = smov 87   ;;  %s682_s17 = smov 62   ;;  %v345_v62 = vld [vmem:[%s1184_s0] sm:$0x1]   ;;  %v551_v63 = vld [vmem:[%s1184_s0 + $0x3] sm:$0x1]  }
  0x1b   :  { %v553_v0 = vld [vmem:[%s1184_s0 + $0x2] sm:$0x1]   ;;  %v555_v1 = vld [vmem:[%s1184_s0 + $0x1] sm:$0x1]   ;;  %v2_v2 = vld [vmem:[%s1184_s0] sm:$0x1]  }
  0x1c   :  { %4 = vst.msk [vmem:[%s1185_s1] sm:$0x1] %vm3_vm4, %v2_v2   ;;  %v372_v3 = vld [vmem:[%s1184_s0] sm:$0x1]   ;;  %v558_v4 = vld [vmem:[%s1184_s0 + $0x3] sm:$0x1]  }
  0x1d   :  { %s701_s26 = smov 20   ;;  %v560_v7 = vld [vmem:[%s1184_s0 + $0x2] sm:$0x1]   ;;  %v562_v8 = vld [vmem:[%s1184_s0 + $0x1] sm:$0x1]   ;;  %vm413_vm5 = vcmask 64512  }
  0x1e   :  { %102 = vrot.lane.b32.xlu0 %v101_v14, %s657_s23  ;;  %109 = vrot.lane.b32.xlu1 %v487_v15, %s658_s24  ;;  %s667_s24 = smov 83   ;;  %s684_s23 = smov 58   ;;  %v399_v11 = vld [vmem:[%s1184_s0] sm:$0x1]   ;;  %vm427_vm6 = vcmask 48128   ;;  %vm416_vm7 = vcmask 72768  }
  0x1f   :  { %vm430_vm8 = vcmask 72752   ;;  %vm441_vm9 = vcmask 31744   ;;  %vm454_vm10 = vcmask 15360   ;;  %vm444_vm11 = vcmask 72736  }
  0x20   :  { %vm457_vm12 = vcmask 72720  }
  0x22   :  { %116 = vrot.lane.b32.xlu0 %v489_v16, %s659_s29  ;;  %123 = vrot.lane.b32.xlu1 %v491_v17, %s660_s30  ;;  %s669_s30 = smov 80   ;;  %s686_s29 = smov 53  }
  0x26   :  { %130 = vrot.lane.b32.xlu0 %v493_v18, %s661_s6  ;;  %136 = vrot.lane.b32.xlu1 %v135_v19, %s662_s7  ;;  %s671_s7 = smov 76   ;;  %s688_s6 = smov 49  }
  0x2a   :  { %143 = vrot.lane.b32.xlu0 %v496_v20, %s663_s12  ;;  %150 = vrot.lane.b32.xlu1 %v498_v21, %s664_s13  ;;  %s673_s13 = smov 73   ;;  %s690_s12 = smov 44  }
  0x2e   :  { %157 = vrot.lane.b32.xlu0 %v500_v22, %s665_s18  ;;  %164 = vrot.lane.b32.xlu1 %v502_v23, %s666_s19  ;;  %s692_s18 = smov 40  }
  0x32   :  { %170 = vrot.lane.b32.xlu0 %v169_v24, %s667_s24  ;;  %177 = vrot.lane.b32.xlu1 %v505_v25, %s668_s25  ;;  %s694_s24 = smov 35  }
  0x36   :  { %184 = vrot.lane.b32.xlu0 %v507_v26, %s669_s30  ;;  %191 = vrot.lane.b32.xlu1 %v509_v27, %s670_s2  ;;  %s696_s30 = smov 31  }
  0x3a   :  { %198 = vrot.lane.b32.xlu0 %v511_v28, %s671_s7  ;;  %204 = vrot.lane.b32.xlu1 %v203_v29, %s672_s8  ;;  %s677_s8 = smov 8   ;;  %s698_s7 = smov 26  }
  0x3e   :  { %211 = vrot.lane.b32.xlu0 %v514_v30, %s673_s13  ;;  %218 = vrot.lane.b32.xlu1 %v516_v31, %s674_s14  ;;  %s705_s14 = smov 11  }
  0x42   :  { %225 = vrot.lane.b32.xlu0 %v518_v32, %s675_s27  ;;  %232 = vrot.lane.b32.xlu1 %v520_v33, %s676_s28  ;;  %s685_s28 = smov 56   ;;  %s702_s27 = smov 17  }
  0x46   :  { %411 = vrot.lane.b32.xlu0 %v410_v38, %s677_s8  ;;  %425 = vrot.lane.b32.xlu1 %v424_v39, %s678_s9  ;;  %s704_s8 = smov 13  }
  0x4a   :  { %439 = vrot.lane.b32.xlu0 %v438_v44, %s679_s10  ;;  %452 = vrot.lane.b32.xlu1 %v451_v45, %s680_s11  ;;  %s689_s11 = smov 47  }
  0x4e   :  { %238 = vrot.lane.b32.xlu0 %v237_v46, %s681_s16  ;;  %245 = vrot.lane.b32.xlu1 %v523_v47, %s682_s17  ;;  %s691_s17 = smov 42   ;;  %s699_s16 = smov 24  }
  0x52   :  { %252 = vrot.lane.b32.xlu0 %v525_v48, %s683_s22  ;;  %259 = vrot.lane.b32.xlu1 %v527_v49, %s684_s23  ;;  %s693_s23 = smov 38  }
  0x56   :  { %265 = vrot.lane.b32.xlu0 %v264_v50, %s685_s28  ;;  %272 = vrot.lane.b32.xlu1 %v530_v51, %s686_s29  ;;  %s695_s29 = smov 33  }
  0x5a   :  { %279 = vrot.lane.b32.xlu0 %v532_v52, %s687_s5  ;;  %286 = vrot.lane.b32.xlu1 %v534_v53, %s688_s6  ;;  %s697_s6 = smov 29  }
  0x5e   :  { %292 = vrot.lane.b32.xlu0 %v291_v54, %s689_s11  ;;  %299 = vrot.lane.b32.xlu1 %v537_v55, %s690_s12 }
  0x62   :  { %306 = vrot.lane.b32.xlu0 %v539_v56, %s691_s17  ;;  %313 = vrot.lane.b32.xlu1 %v541_v57, %s692_s18  ;;  %s700_s17 = smov 22  }
  0x66   :  { %319 = vrot.lane.b32.xlu0 %v318_v58, %s693_s23  ;;  %326 = vrot.lane.b32.xlu1 %v544_v59, %s694_s24 }
  0x6a   :  { %333 = vrot.lane.b32.xlu0 %v546_v60, %s695_s29  ;;  %340 = vrot.lane.b32.xlu1 %v548_v61, %s696_s30 }
  0x6e   :  { %346 = vrot.lane.b32.xlu0 %v345_v62, %s697_s6  ;;  %353 = vrot.lane.b32.xlu1 %v551_v63, %s698_s7  ;;  %s703_s7 = smov 15  }
  0x72   :  { %360 = vrot.lane.b32.xlu0 %v553_v0, %s699_s16  ;;  %367 = vrot.lane.b32.xlu1 %v555_v1, %s700_s17 }
  0x74   :  { %v8_v5 = vpop.permute.xlu0 %7   ;;  %v22_v6 = vpop.permute.xlu1 %21  }
  0x75   :  { %461 = vst.msk [vmem:[%s1185_s1 + $0x39] sm:$0x1] %vm3_vm4, %v8_v5   ;;  %465 = vst.msk [vmem:[%s1185_s1 + $0x1d] sm:$0x1] %vm3_vm4, %v22_v6  }
  0x76   :  { %373 = vrot.lane.b32.xlu0 %v372_v3, %s701_s26  ;;  %380 = vrot.lane.b32.xlu1 %v558_v4, %s702_s27 }
  0x78   :  { %v15_v9 = vpop.permute.xlu0 %14   ;;  %v29_v10 = vpop.permute.xlu1 %28  }
  0x79   :  { %463 = vst.msk [vmem:[%s1185_s1 + $0x2b] sm:$0x1] %vm3_vm4, %v15_v9   ;;  %467 = vst.msk [vmem:[%s1185_s1 + $0xf] sm:$0x1] %vm3_vm4, %v29_v10  }
  0x7a   :  { %387 = vrot.lane.b32.xlu0 %v560_v7, %s703_s7  ;;  %394 = vrot.lane.b32.xlu1 %v562_v8, %s704_s8 }
  0x7c   :  { %v35_v12 = vpop.permute.xlu0 %34   ;;  %v42_v13 = vpop.permute.xlu1 %41  }
  0x7d   :  { %468 = vst.msk [vmem:[%s1185_s1 + $0x1] sm:$0x1] %vm3_vm4, %v35_v12   ;;  %470 = vst.msk [vmem:[%s1185_s1 + $0x3a] sm:$0x1] %vm3_vm4, %v42_v13  }
  0x7e   :  { %400 = vrot.lane.b32.xlu0 %v399_v11, %s705_s14 }
  0x80   :  { %v49_v14 = vpop.permute.xlu0 %48   ;;  %v56_v15 = vpop.permute.xlu1 %55  }
  0x81   :  { %472 = vst.msk [vmem:[%s1185_s1 + $0x2c] sm:$0x1] %vm3_vm4, %v49_v14   ;;  %474 = vst.msk [vmem:[%s1185_s1 + $0x1e] sm:$0x1] %vm3_vm4, %v56_v15  }
  0x84   :  { %v63_v16 = vpop.permute.xlu0 %62   ;;  %v69_v17 = vpop.permute.xlu1 %68  }
  0x85   :  { %476 = vst.msk [vmem:[%s1185_s1 + $0x10] sm:$0x1] %vm3_vm4, %v63_v16   ;;  %477 = vst.msk [vmem:[%s1185_s1 + $0x2] sm:$0x1] %vm3_vm4, %v69_v17  }
  0x88   :  { %v76_v18 = vpop.permute.xlu0 %75   ;;  %v83_v19 = vpop.permute.xlu1 %82  }
  0x89   :  { %479 = vst.msk [vmem:[%s1185_s1 + $0x3b] sm:$0x1] %vm3_vm4, %v76_v18   ;;  %481 = vst.msk [vmem:[%s1185_s1 + $0x2d] sm:$0x1] %vm3_vm4, %v83_v19  }
  0x8c   :  { %v90_v20 = vpop.permute.xlu0 %89   ;;  %v97_v21 = vpop.permute.xlu1 %96  }
  0x8d   :  { %483 = vst.msk [vmem:[%s1185_s1 + $0x1f] sm:$0x1] %vm3_vm4, %v90_v20   ;;  %485 = vst.msk [vmem:[%s1185_s1 + $0x11] sm:$0x1] %vm3_vm4, %v97_v21  }
  0x90   :  { %v103_v22 = vpop.permute.xlu0 %102   ;;  %v110_v23 = vpop.permute.xlu1 %109  }
  0x91   :  { %486 = vst.msk [vmem:[%s1185_s1 + $0x3] sm:$0x1] %vm3_vm4, %v103_v22   ;;  %488 = vst.msk [vmem:[%s1185_s1 + $0x3c] sm:$0x1] %vm3_vm4, %v110_v23  }
  0x94   :  { %v117_v24 = vpop.permute.xlu0 %116   ;;  %v124_v25 = vpop.permute.xlu1 %123  }
  0x95   :  { %490 = vst.msk [vmem:[%s1185_s1 + $0x2e] sm:$0x1] %vm3_vm4, %v117_v24   ;;  %492 = vst.msk [vmem:[%s1185_s1 + $0x20] sm:$0x1] %vm3_vm4, %v124_v25  }
  0x98   :  { %v131_v26 = vpop.permute.xlu0 %130   ;;  %v137_v27 = vpop.permute.xlu1 %136  }
  0x99   :  { %494 = vst.msk [vmem:[%s1185_s1 + $0x12] sm:$0x1] %vm3_vm4, %v131_v26   ;;  %495 = vst.msk [vmem:[%s1185_s1 + $0x4] sm:$0x1] %vm3_vm4, %v137_v27  }
  0x9c   :  { %v144_v28 = vpop.permute.xlu0 %143   ;;  %v151_v29 = vpop.permute.xlu1 %150  }
  0x9d   :  { %497 = vst.msk [vmem:[%s1185_s1 + $0x3d] sm:$0x1] %vm3_vm4, %v144_v28   ;;  %499 = vst.msk [vmem:[%s1185_s1 + $0x2f] sm:$0x1] %vm3_vm4, %v151_v29  }
  0xa0   :  { %v158_v30 = vpop.permute.xlu0 %157   ;;  %v165_v31 = vpop.permute.xlu1 %164  }
  0xa1   :  { %501 = vst.msk [vmem:[%s1185_s1 + $0x21] sm:$0x1] %vm3_vm4, %v158_v30   ;;  %503 = vst.msk [vmem:[%s1185_s1 + $0x13] sm:$0x1] %vm3_vm4, %v165_v31  }
  0xa4   :  { %v171_v32 = vpop.permute.xlu0 %170   ;;  %v178_v33 = vpop.permute.xlu1 %177  }
  0xa5   :  { %504 = vst.msk [vmem:[%s1185_s1 + $0x5] sm:$0x1] %vm3_vm4, %v171_v32   ;;  %506 = vst.msk [vmem:[%s1185_s1 + $0x3e] sm:$0x1] %vm3_vm4, %v178_v33  }
  0xa8   :  { %v185_v34 = vpop.permute.xlu0 %184   ;;  %v192_v35 = vpop.permute.xlu1 %191  }
  0xa9   :  { %508 = vst.msk [vmem:[%s1185_s1 + $0x30] sm:$0x1] %vm3_vm4, %v185_v34   ;;  %510 = vst.msk [vmem:[%s1185_s1 + $0x22] sm:$0x1] %vm3_vm4, %v192_v35  }
  0xac   :  { %v199_v36 = vpop.permute.xlu0 %198   ;;  %v205_v37 = vpop.permute.xlu1 %204  }
  0xad   :  { %512 = vst.msk [vmem:[%s1185_s1 + $0x14] sm:$0x1] %vm3_vm4, %v199_v36   ;;  %513 = vst.msk [vmem:[%s1185_s1 + $0x6] sm:$0x1] %vm3_vm4, %v205_v37  }
  0xb0   :  { %v212_v38 = vpop.permute.xlu0 %211   ;;  %v219_v39 = vpop.permute.xlu1 %218  }
  0xb1   :  { %515 = vst.msk [vmem:[%s1185_s1 + $0x3f] sm:$0x1] %vm3_vm4, %v212_v38   ;;  %517 = vst.msk [vmem:[%s1185_s1 + $0x31] sm:$0x1] %vm3_vm4, %v219_v39  }
  0xb4   :  { %v226_v40 = vpop.permute.xlu0 %225   ;;  %v233_v41 = vpop.permute.xlu1 %232  }
  0xb5   :  { %519 = vst.msk [vmem:[%s1185_s1 + $0x23] sm:$0x1] %vm3_vm4, %v226_v40   ;;  %521 = vst.msk [vmem:[%s1185_s1 + $0x15] sm:$0x1] %vm3_vm4, %v233_v41  }
  0xb8   :  { %v412_v42 = vpop.permute.xlu0 %411   ;;  %v426_v43 = vpop.permute.xlu1 %425  }
  0xb9   :  { %567 = vst.msk [vmem:[%s1185_s1 + $0x38] sm:$0x1] %vm413_vm5, %v412_v42  }
  0xba   :  { %571 = vst.msk [vmem:[%s1185_s1 + $0x2a] sm:$0x1] %vm427_vm6, %v426_v43  }
  0xbb   :  { %568 = vst.msk [vmem:[%s1185_s1 + $0x38] sm:$0x1] %vm416_vm7, %v412_v42  }
  0xbc   :  { %572 = vst.msk [vmem:[%s1185_s1 + $0x2a] sm:$0x1] %vm430_vm8, %v426_v43   ;;  %v440_v44 = vpop.permute.xlu0 %439   ;;  %v453_v45 = vpop.permute.xlu1 %452  }
  0xbd   :  { %575 = vst.msk [vmem:[%s1185_s1 + $0x1c] sm:$0x1] %vm441_vm9, %v440_v44  }
  0xbe   :  { %578 = vst.msk [vmem:[%s1185_s1 + $0xe] sm:$0x1] %vm454_vm10, %v453_v45  }
  0xbf   :  { %576 = vst.msk [vmem:[%s1185_s1 + $0x1c] sm:$0x1] %vm444_vm11, %v440_v44  }
  0xc0   :  { %579 = vst.msk [vmem:[%s1185_s1 + $0xe] sm:$0x1] %vm457_vm12, %v453_v45   ;;  %v239_v46 = vpop.permute.xlu0 %238   ;;  %v246_v47 = vpop.permute.xlu1 %245  }
  0xc1   :  { %522 = vst.msk [vmem:[%s1185_s1 + $0x7] sm:$0x1] %vm3_vm4, %v239_v46   ;;  %524 = vst.msk [vmem:[%s1185_s1 + $0x32] sm:$0x1] %vm3_vm4, %v246_v47  }
  0xc4   :  { %v253_v48 = vpop.permute.xlu0 %252   ;;  %v260_v49 = vpop.permute.xlu1 %259  }
  0xc5   :  { %526 = vst.msk [vmem:[%s1185_s1 + $0x24] sm:$0x1] %vm3_vm4, %v253_v48   ;;  %528 = vst.msk [vmem:[%s1185_s1 + $0x16] sm:$0x1] %vm3_vm4, %v260_v49  }
  0xc8   :  { %v266_v50 = vpop.permute.xlu0 %265   ;;  %v273_v51 = vpop.permute.xlu1 %272  }
  0xc9   :  { %529 = vst.msk [vmem:[%s1185_s1 + $0x8] sm:$0x1] %vm3_vm4, %v266_v50   ;;  %531 = vst.msk [vmem:[%s1185_s1 + $0x33] sm:$0x1] %vm3_vm4, %v273_v51  }
  0xcc   :  { %v280_v52 = vpop.permute.xlu0 %279   ;;  %v287_v53 = vpop.permute.xlu1 %286  }
  0xcd   :  { %533 = vst.msk [vmem:[%s1185_s1 + $0x25] sm:$0x1] %vm3_vm4, %v280_v52   ;;  %535 = vst.msk [vmem:[%s1185_s1 + $0x17] sm:$0x1] %vm3_vm4, %v287_v53  }
  0xd0   :  { %v293_v54 = vpop.permute.xlu0 %292   ;;  %v300_v55 = vpop.permute.xlu1 %299  }
  0xd1   :  { %536 = vst.msk [vmem:[%s1185_s1 + $0x9] sm:$0x1] %vm3_vm4, %v293_v54   ;;  %538 = vst.msk [vmem:[%s1185_s1 + $0x34] sm:$0x1] %vm3_vm4, %v300_v55  }
  0xd4   :  { %v307_v56 = vpop.permute.xlu0 %306   ;;  %v314_v57 = vpop.permute.xlu1 %313  }
  0xd5   :  { %540 = vst.msk [vmem:[%s1185_s1 + $0x26] sm:$0x1] %vm3_vm4, %v307_v56   ;;  %542 = vst.msk [vmem:[%s1185_s1 + $0x18] sm:$0x1] %vm3_vm4, %v314_v57  }
  0xd8   :  { %v320_v58 = vpop.permute.xlu0 %319   ;;  %v327_v59 = vpop.permute.xlu1 %326  }
  0xd9   :  { %543 = vst.msk [vmem:[%s1185_s1 + $0xa] sm:$0x1] %vm3_vm4, %v320_v58   ;;  %545 = vst.msk [vmem:[%s1185_s1 + $0x35] sm:$0x1] %vm3_vm4, %v327_v59  }
  0xdc   :  { %v334_v60 = vpop.permute.xlu0 %333   ;;  %v341_v61 = vpop.permute.xlu1 %340  }
  0xdd   :  { %547 = vst.msk [vmem:[%s1185_s1 + $0x27] sm:$0x1] %vm3_vm4, %v334_v60   ;;  %549 = vst.msk [vmem:[%s1185_s1 + $0x19] sm:$0x1] %vm3_vm4, %v341_v61  }
  0xe0   :  { %v347_v62 = vpop.permute.xlu0 %346   ;;  %v354_v63 = vpop.permute.xlu1 %353  }
  0xe1   :  { %550 = vst.msk [vmem:[%s1185_s1 + $0xb] sm:$0x1] %vm3_vm4, %v347_v62   ;;  %552 = vst.msk [vmem:[%s1185_s1 + $0x36] sm:$0x1] %vm3_vm4, %v354_v63  }
  0xe4   :  { %v361_v0 = vpop.permute.xlu0 %360   ;;  %v368_v1 = vpop.permute.xlu1 %367  }
  0xe5   :  { %554 = vst.msk [vmem:[%s1185_s1 + $0x28] sm:$0x1] %vm3_vm4, %v361_v0   ;;  %556 = vst.msk [vmem:[%s1185_s1 + $0x1a] sm:$0x1] %vm3_vm4, %v368_v1  }
  0xe8   :  { %v374_v2 = vpop.permute.xlu0 %373   ;;  %v381_v3 = vpop.permute.xlu1 %380  }
  0xe9   :  { %557 = vst.msk [vmem:[%s1185_s1 + $0xc] sm:$0x1] %vm3_vm4, %v374_v2   ;;  %559 = vst.msk [vmem:[%s1185_s1 + $0x37] sm:$0x1] %vm3_vm4, %v381_v3  }
  0xec   :  { %v388_v4 = vpop.permute.xlu0 %387   ;;  %v395_v5 = vpop.permute.xlu1 %394  }
  0xed   :  { %561 = vst.msk [vmem:[%s1185_s1 + $0x29] sm:$0x1] %vm3_vm4, %v388_v4   ;;  %563 = vst.msk [vmem:[%s1185_s1 + $0x1b] sm:$0x1] %vm3_vm4, %v395_v5  }
  0xf0   :  { %v401_v6 = vpop.permute.xlu0 %400  }
  0xf1   :  { %564 = vst.msk [vmem:[%s1185_s1 + $0xd] sm:$0x1] %vm3_vm4, %v401_v6  }

// kernel: discriminator_forward.1
= control target key start
LH: loop header
LB: loop body
LE: loop exit
PB: predicated region body
PF: predicated region fallthrough
CT: control target
= control target key end

     0   :  { %15 = vsyncpa [#allocation6], 0  ;;  %s3976_s0 = inlined_call_operand.vmem [shape: f32[196,4], index: 0, kind: input, shape index: {}]   ;;  %s3977_s1 = inlined_call_operand.vmem [shape: bf16[16,64], index: 1, kind: input, shape index: {}]   ;;  %s3978_s2 = inlined_call_operand.vmem [shape: f32[1,64], index: 2, kind: input, shape index: {}]   ;;  %s3979_s3 = inlined_call_operand.vmem [shape: bf16[256,128], index: 3, kind: input, shape index: {}]   ;;  %s3980_s4 = inlined_call_operand.vmem [shape: f32[1,128], index: 4, kind: input, shape index: {}]   ;;  %s3981_s5 = inlined_call_operand.vmem [shape: bf16[512,256], index: 5, kind: input, shape index: {}]   ;;  %s3982_s6 = inlined_call_operand.vmem [shape: f32[1,256], index: 6, kind: input, shape index: {}]   ;;  %s3983_s7 = inlined_call_operand.vmem [shape: f32[12,256], index: 7, kind: input, shape index: {}]   ;;  %s3984_s8 = inlined_call_operand.vmem [shape: f32[2], index: 8, kind: input, shape index: {}]   ;;  %s3985_s9 = inlined_call_operand.vmem [shape: f32[2], index: 9, kind: input, shape index: {}]   ;;  %s3986_s10 = inlined_call_operand.hbm [shape: f32[1,2], index: 10, kind: output, shape index: {}]  }
   0x1   :  { %16 = vsyncpa [#allocation8], 0 }
   0x2   :  { %17 = vsyncpa [#allocation5], 0  ;;  %s40_s15 = sshll.u32 %s3984_s8, 4  ;;  %s50_s18 = sshll.u32 %s3985_s9, 4  ;;  %s41_s15 = int_to_ptr.vmem [resolvable:$true] %s40_s15  ;;  %s51_s18 = int_to_ptr.vmem [resolvable:$true] %s50_s18 }
   0x3   :  { %s3067_s19 = scalar_lea.vmem %s41_s15, 16  ;;  %p3072_p1 = scmp.lt.s32.totalorder %s41_s15, %s41_s15 }
   0x4   :  { %p3068_p0 = scmp.ne.s32.totalorder %s41_s15, %s3067_s19  ;;  %p3073_p2 = scmp.lt.s32.totalorder %s3067_s19, %s3067_s19 }
   0x6   :  { %p3074_p3 = por %p3073_p2, %p3072_p1 }
   0x8   :  { %p3075_p4 = pnand %p3074_p3, %p3068_p0 }
   0xa   :  { %3078 = shalt.err (!%p3075_p4)
}
   0xb   :  { %s3119_s20 = smov [#allocation4]   ;;  %s3079_s21 = scalar_lea.vmem %s51_s18, 16 }
   0xc   :  { %43 = dma.vmem_to_smem %s41_s15, 16, %s3119_s20, [#allocation6]  }
   0xd   :  { %p3080_p5 = scmp.ne.s32.totalorder %s51_s18, %s3079_s21  ;;  %p3084_p6 = scmp.lt.s32.totalorder %s51_s18, %s51_s18 }
   0xe   :  { %p3085_p7 = scmp.lt.s32.totalorder %s3079_s21, %s3079_s21 }
  0x10   :  { %p3086_p8 = por %p3085_p7, %p3084_p6 }
  0x12   :  { %p3087_p9 = pnand %p3086_p8, %p3080_p5 }
  0x14   :  { %3090 = shalt.err (!%p3087_p9)
}
  0x15   :  { %s3120_s8 = smov [#allocation7]  }
  0x16   :  { %53 = dma.vmem_to_smem %s51_s18, 16, %s3120_s8, [#allocation8]  }
  0x17   :  { %3113 = dma.done.wait [#allocation6], 16  }
  0x18   :  { %3114 = vsyncadd [#allocation6], 4294967280 }
  0x19   :  { %3115 = dma.done.wait [#allocation8], 16  }
  0x1a   :  { %3116 = vsyncadd [#allocation8], 4294967280 }
  0x1b   :  { %60 = sfence }
  0x1c   :  { %v2470_v0 = vld [vmem:[%s3976_s0 + $0x3] ss:$2 sm:$0xff]  ;;  %v2471_v1 = vld [vmem:[%s3976_s0 + $0x13] ss:$2 sm:$0xff]  ;;  %v2464_v8 = vld [vmem:[%s3976_s0 + $0x2] ss:$2 sm:$0xff] }
  0x1d   :  { %v2807_v2 = vpack.i.bf16 %v2471_v1, %v2470_v0  ;;  %v2458_v3 = vld [vmem:[%s3976_s0 + $0x1] ss:$2 sm:$0xff]  ;;  %v2459_v4 = vld [vmem:[%s3976_s0 + $0x11] ss:$2 sm:$0xff]  ;;  %v2465_v9 = vld [vmem:[%s3976_s0 + $0x12] ss:$2 sm:$0xff] }
  0x1e   :  { %v2460_v5 = vld [vmem:[%s3976_s0 + $0x21] ss:$2 sm:$0xff]  ;;  %v2797_v6 = vpack.i.bf16 %v2459_v4, %v2458_v3  ;;  %v2461_v7 = vld [vmem:[%s3976_s0 + $0x31] ss:$2 sm:$0xff]  ;;  %s3121_s17 = smov 12   ;;  %s3122_s18 = smov 4   ;;  %v2802_v11 = vpack.i.bf16 %v2465_v9, %v2464_v8 }
  0x1f   :  { %2808 = vrot.lane.b32.xlu1 %v2807_v2, %s3121_s17  ;;  %v2812_v10 = vpack.i.bf16 %v2461_v7, %v2460_v5  ;;  %v2466_v12 = vld [vmem:[%s3976_s0 + $0x22] ss:$2 sm:$0xff]  ;;  %v2467_v13 = vld [vmem:[%s3976_s0 + $0x32] ss:$2 sm:$0xff]  ;;  %v2569_v14 = vld [vmem:[%s3976_s0 + $0x63] ss:$2 sm:$0xff] }
  0x20   :  { %2798 = vrot.lane.b32.xlu0 %v2797_v6, %s3122_s18  ;;  %v2570_v15 = vld [vmem:[%s3976_s0 + $0x73] ss:$2 sm:$0xff]  ;;  %v2822_v16 = vpack.i.bf16 %v2467_v13, %v2466_v12  ;;  %s3123_s25 = smov 8   ;;  %v2472_v18 = vld [vmem:[%s3976_s0 + $0x23] ss:$2 sm:$0xff]  ;;  %v3124_v30 = vmov 0.0  }
  0x21   :  { %v2817_v17 = vpack.i.bf16 %v2570_v15, %v2569_v14  ;;  %v2473_v19 = vld [vmem:[%s3976_s0 + $0x33] ss:$2 sm:$0xff]  ;;  %v2575_v20 = vld [vmem:[%s3976_s0 + $0x64] ss:$2 sm:$0xff]  ;;  %v2576_v21 = vld [vmem:[%s3976_s0 + $0x74] ss:$2 sm:$0xff]  ;;  %2740 = vmatprep.subr.bf16.mxu0 %v3124_v30  ;;  %2754 = vmatprep.subr.bf16.mxu1 %v3124_v30 }
  0x22   :  { %v2832_v22 = vpack.i.bf16 %v2473_v19, %v2472_v18  ;;  %v2827_v23 = vpack.i.bf16 %v2576_v21, %v2575_v20  ;;  %v2462_v24 = vld [vmem:[%s3976_s0 + $0x41] ss:$2 sm:$0xff]  ;;  %v2463_v25 = vld [vmem:[%s3976_s0 + $0x51] ss:$2 sm:$0xff]  ;;  %v2468_v28 = vld [vmem:[%s3976_s0 + $0x42] ss:$2 sm:$0xff] }
  0x23   :  { %2813 = vrot.lane.b32.xlu1 %v2812_v10, %s3122_s18  ;;  %v2581_v26 = vld [vmem:[%s3976_s0 + $0x65] ss:$2 sm:$0xff]  ;;  %v2582_v27 = vld [vmem:[%s3976_s0 + $0x75] ss:$2 sm:$0xff]  ;;  %v2842_v29 = vpack.i.bf16 %v2463_v25, %v2462_v24  ;;  %71 = vst [vmem:[#allocation3] sm:$0xff] %v3124_v30  ;;  %75 = vst [vmem:[#allocation3 + $0x20] sm:$0xff] %v3124_v30 }
  0x24   :  { %2803 = vrot.lane.b32.xlu0 %v2802_v11, %s3123_s25  ;;  %v2917_v31 = vld [vmem:[%s3977_s1] sm:$0xff]   ;;  %v2837_v32 = vpack.i.bf16 %v2582_v27, %v2581_v26  ;;  %vm3125_vm0 = vmmov 0   ;;  %vm62_vm1 = vcmask 523264   ;;  %vm195_vm2 = vcmask 31744   ;;  %v2453_v62 = vld [vmem:[%s3976_s0 + $0x10] ss:$2 sm:$0xff] }
  0x25   :  { %v2469_v33 = vld [vmem:[%s3976_s0 + $0x52] ss:$2 sm:$0xff]  ;;  %v2571_v34 = vld [vmem:[%s3976_s0 + $0x83] ss:$2 sm:$0xff]  ;;  %v2572_v35 = vld [vmem:[%s3976_s0 + $0x93] ss:$2 sm:$0xff]  ;;  %2742 = vmatprep.mubr.msk.bf16.mxu0 %vm3125_vm0, %v3124_v30  ;;  %2741 = vmatpush3.bf16.msra.mxu0 %v2917_v31 }
  0x26   :  { %v2918_v36 = vld [vmem:[%s3977_s1] sm:$0xff]   ;;  %2756 = vmatprep.mubr.msk.bf16.mxu1 %vm3125_vm0, %v3124_v30  ;;  %v2852_v39 = vpack.i.bf16 %v2469_v33, %v2468_v28  ;;  %v2847_v42 = vpack.i.bf16 %v2572_v35, %v2571_v34  ;;  %63 = vst.msk [vmem:[#allocation2] sm:$0xff] %vm62_vm1, %v3124_v30  ;;  %64 = vst.msk [vmem:[#allocation2 + $0x8] sm:$0xff] %vm62_vm1, %v3124_v30  ;;  %vm202_vm3 = vcmask 64512   ;;  %vm209_vm4 = vcmask 97280   ;;  %s3126_s23 = smov 64  }
  0x27   :  { %2823 = vrot.lane.b32.xlu1 %v2822_v16, %s3123_s25  ;;  %v2474_v37 = vld [vmem:[%s3976_s0 + $0x43] ss:$2 sm:$0xff]  ;;  %v2475_v38 = vld [vmem:[%s3976_s0 + $0x53] ss:$2 sm:$0xff]  ;;  %v2577_v40 = vld [vmem:[%s3976_s0 + $0x84] ss:$2 sm:$0xff]  ;;  %2755 = vmatpush3.bf16.msra.mxu1 %v2918_v36 }
  0x28   :  { %2818 = vrot.lane.b32.xlu0 %v2817_v17, %s3122_s18  ;;  %v2578_v41 = vld [vmem:[%s3976_s0 + $0x94] ss:$2 sm:$0xff]  ;;  %v2573_v43 = vld [vmem:[%s3976_s0 + $0xa3] ss:$2 sm:$0xff]  ;;  %v2574_v44 = vld [vmem:[%s3976_s0 + $0xb3] ss:$2 sm:$0xff]  ;;  %v2862_v45 = vpack.i.bf16 %v2475_v38, %v2474_v37 }
  0x29   :  { %v2583_v46 = vld [vmem:[%s3976_s0 + $0x85] ss:$2 sm:$0xff]  ;;  %v2584_v47 = vld [vmem:[%s3976_s0 + $0x95] ss:$2 sm:$0xff]  ;;  %v2857_v48 = vpack.i.bf16 %v2578_v41, %v2577_v40  ;;  %v2872_v51 = vpack.i.bf16 %v2574_v44, %v2573_v43  ;;  %v2579_v52 = vld [vmem:[%s3976_s0 + $0xa4] ss:$2 sm:$0xff] }
  0x2a   :  { %v2585_v49 = vld [vmem:[%s3976_s0 + $0xa5] ss:$2 sm:$0xff]  ;;  %v2586_v50 = vld [vmem:[%s3976_s0 + $0xb5] ss:$2 sm:$0xff]  ;;  %v2580_v53 = vld [vmem:[%s3976_s0 + $0xb4] ss:$2 sm:$0xff]  ;;  %v2867_v54 = vpack.i.bf16 %v2584_v47, %v2583_v46 }
  0x2b   :  { %2833 = vrot.lane.b32.xlu1 %v2832_v22, %s3121_s17  ;;  %v2882_v55 = vpack.i.bf16 %v2586_v50, %v2585_v49  ;;  %v2877_v56 = vpack.i.bf16 %v2580_v53, %v2579_v52  ;;  %65 = vst.msk [vmem:[#allocation2 + $0x10] sm:$0xff] %vm62_vm1, %v3124_v30  ;;  %66 = vst.msk [vmem:[#allocation2 + $0x18] sm:$0xff] %vm62_vm1, %v3124_v30  ;;  %v76_v61 = vld [vmem:[%s3976_s0] ss:$2 sm:$0xff]  ;;  %v2455_v10 = vld [vmem:[%s3976_s0 + $0x30] ss:$2 sm:$0xff] }
  0x2c   :  { %2828 = vrot.lane.b32.xlu0 %v2827_v23, %s3123_s25  ;;  %67 = vst.msk [vmem:[#allocation2 + $0x20] sm:$0xff] %vm62_vm1, %v3124_v30  ;;  %68 = vst.msk [vmem:[#allocation2 + $0x28] sm:$0xff] %vm62_vm1, %v3124_v30  ;;  %v2454_v9 = vld [vmem:[%s3976_s0 + $0x20] ss:$2 sm:$0xff]  ;;  %vm234_vm5 = vcmask 130048   ;;  %s1257_s9 = sld [smem:[#allocation4]] }
  0x2d   :  { %69 = vst.msk [vmem:[#allocation2 + $0x30] sm:$0xff] %vm62_vm1, %v3124_v30  ;;  %70 = vst.msk [vmem:[#allocation2 + $0x38] sm:$0xff] %vm62_vm1, %v3124_v30  ;;  %v2563_v31 = vld [vmem:[%s3976_s0 + $0x62] ss:$2 sm:$0xff] }
  0x2e   :  { %v2457_v49 = vld [vmem:[%s3976_s0 + $0x50] ss:$2 sm:$0xff] }
  0x2f   :  { %2843 = vrot.lane.b32.xlu1 %v2842_v29, %s3122_s18 }
  0x30   :  { %2838 = vrot.lane.b32.xlu0 %v2837_v32, %s3121_s17  ;;  %v2564_v32 = vld [vmem:[%s3976_s0 + $0x72] ss:$2 sm:$0xff] }
  0x33   :  { %2853 = vrot.lane.b32.xlu1 %v2852_v39, %s3123_s25 }
  0x34   :  { %2848 = vrot.lane.b32.xlu0 %v2847_v42, %s3122_s18 }
  0x37   :  { %2863 = vrot.lane.b32.xlu1 %v2862_v45, %s3121_s17 }
  0x38   :  { %2858 = vrot.lane.b32.xlu0 %v2857_v48, %s3123_s25  ;;  %v2456_v48 = vld [vmem:[%s3976_s0 + $0x40] ss:$2 sm:$0xff] }
  0x3b   :  { %2873 = vrot.lane.b32.xlu1 %v2872_v51, %s3122_s18 }
  0x3c   :  { %2868 = vrot.lane.b32.xlu0 %v2867_v54, %s3121_s17 }
  0x3f   :  { %2883 = vrot.lane.b32.xlu1 %v2882_v55, %s3121_s17  ;;  %s2673_s17 = sld [smem:[#allocation4 + $0x1]] }
  0x40   :  { %2878 = vrot.lane.b32.xlu0 %v2877_v56, %s3123_s25  ;;  %s2562_s25 = sld [smem:[#allocation7 + $0x1]] }
  0x91   :  { %v2809_v57 = vpop.permute.xlu1 %2808 }
  0x92   :  { %v2799_v58 = vpop.permute.xlu0 %2798  ;;  %v2811_v0 = vunpack.i.h.bf16 %v2809_v57  ;;  %v2810_v1 = vunpack.i.l.bf16 %v2809_v57 }
  0x93   :  { %v2801_v59 = vunpack.i.h.bf16 %v2799_v58  ;;  %v2800_v60 = vunpack.i.l.bf16 %v2799_v58 }
  0x95   :  { %v2814_v63 = vpop.permute.xlu1 %2813  ;;  %v196_v5 = vsel %vm195_vm2, %v76_v61, %v2800_v60  ;;  %v197_v6 = vsel %vm195_vm2, %v2453_v62, %v2801_v59 }
  0x96   :  { %v2804_v2 = vpop.permute.xlu0 %2803  ;;  %v2816_v7 = vunpack.i.h.bf16 %v2814_v63  ;;  %v2815_v8 = vunpack.i.l.bf16 %v2814_v63 }
  0x97   :  { %v2806_v3 = vunpack.i.h.bf16 %v2804_v2  ;;  %v2805_v4 = vunpack.i.l.bf16 %v2804_v2 }
  0x98   :  { %v198_v20 = vsel %vm195_vm2, %v2454_v9, %v2815_v8  ;;  %v199_v21 = vsel %vm195_vm2, %v2455_v10, %v2816_v7 }
  0x99   :  { %v203_v11 = vsel %vm202_vm3, %v196_v5, %v2805_v4  ;;  %v204_v12 = vsel %vm202_vm3, %v197_v6, %v2806_v3  ;;  %v2824_v13 = vpop.permute.xlu1 %2823  ;;  %v2565_v3 = vld [vmem:[%s3976_s0 + $0x82] ss:$2 sm:$0xff]  ;;  %v2566_v4 = vld [vmem:[%s3976_s0 + $0x92] ss:$2 sm:$0xff] }
  0x9a   :  { %v2819_v14 = vpop.permute.xlu0 %2818  ;;  %v210_v15 = vsel %vm209_vm4, %v203_v11, %v2810_v1  ;;  %v211_v16 = vsel %vm209_vm4, %v204_v12, %v2811_v0  ;;  %v2826_v17 = vunpack.i.h.bf16 %v2824_v13  ;;  %v2825_v18 = vunpack.i.l.bf16 %v2824_v13 }
  0x9b   :  { %v216_v19 = vpack.c.bf16 %v211_v16, %v210_v15  ;;  %v2821_v28 = vunpack.i.h.bf16 %v2819_v14  ;;  %v2820_v29 = vunpack.i.l.bf16 %v2819_v14 }
  0x9c   :  { %v205_v26 = vsel %vm202_vm3, %v198_v20, %v2825_v18  ;;  %v206_v27 = vsel %vm202_vm3, %v199_v21, %v2826_v17  ;;  %v2567_v18 = vld [vmem:[%s3976_s0 + $0xa2] ss:$2 sm:$0xff] }
  0x9d   :  { %2743 = vmatmul.mubr.msk.bf16.vlgmr.msra.gmra.mrb[0].mxu0 %vm234_vm5, %v216_v19  ;;  %v2834_v22 = vpop.permute.xlu1 %2833  ;;  %v1385_v40 = vsel %vm195_vm2, %v2564_v32, %v2821_v28  ;;  %v1384_v41 = vsel %vm195_vm2, %v2563_v31, %v2820_v29  ;;  %v2568_v19 = vld [vmem:[%s3976_s0 + $0xb2] ss:$2 sm:$0xff] }
  0x9e   :  { %v2836_v23 = vunpack.i.h.bf16 %v2834_v22  ;;  %v2835_v24 = vunpack.i.l.bf16 %v2834_v22  ;;  %v2829_v25 = vpop.permute.xlu0 %2828  ;;  %2746 = vmatprep.mubr.msk.bf16.mxu0 %vm3125_vm0, %v3124_v30 }
  0x9f   :  { %v2831_v35 = vunpack.i.h.bf16 %v2829_v25  ;;  %v2830_v36 = vunpack.i.l.bf16 %v2829_v25 }
  0xa0   :  { %v212_v33 = vsel %vm209_vm4, %v205_v26, %v2835_v24  ;;  %v213_v34 = vsel %vm209_vm4, %v206_v27, %v2836_v23 }
  0xa1   :  { %v217_v37 = vpack.c.bf16 %v213_v34, %v212_v33  ;;  %v2844_v38 = vpop.permute.xlu1 %2843  ;;  %v1390_v44 = vsel %vm202_vm3, %v1384_v41, %v2830_v36  ;;  %v1391_v45 = vsel %vm202_vm3, %v1385_v40, %v2831_v35  ;;  %v2920_v40 = vld [vmem:[%s3979_s3] sm:$0xff]   ;;  %v2921_v41 = vld [vmem:[%s3979_s3 + $0x48] sm:$0xff]  }
  0xa2   :  { %v2839_v39 = vpop.permute.xlu0 %2838  ;;  %v2846_v46 = vunpack.i.h.bf16 %v2844_v38  ;;  %v2845_v47 = vunpack.i.l.bf16 %v2844_v38 }
  0xa3   :  { %v2841_v42 = vunpack.i.h.bf16 %v2839_v39  ;;  %v2840_v43 = vunpack.i.l.bf16 %v2839_v39  ;;  %v2919_v39 = vld [vmem:[%s3979_s3 + $0x40] sm:$0xff]  }
  0xa4   :  { %v200_v57 = vsel %vm195_vm2, %v2456_v48, %v2845_v47  ;;  %v201_v58 = vsel %vm195_vm2, %v2457_v49, %v2846_v46  ;;  %2680 = vmatprep.subr.bf16.mxu0 %v2919_v39  ;;  %v2933_v46 = vld [vmem:[%s3979_s3 + $0x8] sm:$0xff]   ;;  %v2935_v47 = vld [vmem:[%s3979_s3 + $0x50] sm:$0xff]   ;;  %v3467_v49 = vld [vmem:[%s3978_s2] ss:$0 sm:$0xff] }
  0xa5   :  { %v1396_v50 = vsel %vm209_vm4, %v1390_v44, %v2840_v43  ;;  %v1397_v51 = vsel %vm209_vm4, %v1391_v45, %v2841_v42  ;;  %2747 = vmatmul.mubr.msk.bf16.gmra.mrb[4].mxu0 %vm234_vm5, %v217_v37  ;;  %v2854_v52 = vpop.permute.xlu1 %2853  ;;  %v2922_v42 = vld [vmem:[%s3979_s3 + $0x8] sm:$0xff]   ;;  %v2929_v43 = vld [vmem:[%s3979_s3] sm:$0xff]   ;;  %v2923_v44 = vld [vmem:[%s3979_s3 + $0x50] sm:$0xff]  }
  0xa6   :  { %v1402_v53 = vpack.c.bf16 %v1397_v51, %v1396_v50  ;;  %v2849_v54 = vpop.permute.xlu0 %2848  ;;  %2750 = vmatprep.mubr.msk.bf16.mxu0 %vm3125_vm0, %v3124_v30  ;;  %v2856_v55 = vunpack.i.h.bf16 %v2854_v52  ;;  %v2855_v56 = vunpack.i.l.bf16 %v2854_v52  ;;  %2681 = vmatpush3.bf16.msra.mxu0 %v2920_v40  ;;  %v2931_v45 = vld [vmem:[%s3979_s3 + $0x48] sm:$0xff]   ;;  %v2924_v48 = vld [vmem:[%s3979_s3 + $0x10] sm:$0xff]   ;;  %v2925_v50 = vld [vmem:[%s3979_s3 + $0x58] sm:$0xff]  }
  0xa7   :  { %v2851_v1 = vunpack.i.h.bf16 %v2849_v54  ;;  %v2850_v2 = vunpack.i.l.bf16 %v2849_v54  ;;  %2682 = vmatprep.subr.bf16.mxu0 %v2921_v41  ;;  %v2937_v51 = vld [vmem:[%s3979_s3 + $0x10] sm:$0xff]  }
  0xa8   :  { %2757 = vmatmul.mubr.msk.bf16.vlgmr.msra.gmra.mrb[0].mxu1 %vm234_vm5, %v1402_v53  ;;  %v207_v63 = vsel %vm202_vm3, %v200_v57, %v2855_v56  ;;  %v208_v0 = vsel %vm202_vm3, %v201_v58, %v2856_v55  ;;  %v2926_v55 = vld [vmem:[%s3979_s3 + $0x18] sm:$0xff]   ;;  %v2928_v57 = vld [vmem:[%s3979_s3 + $0x60] sm:$0xff]  }
  0xa9   :  { %v2864_v59 = vpop.permute.xlu1 %2863  ;;  %2760 = vmatprep.mubr.msk.bf16.mxu1 %vm3125_vm0, %v3124_v30  ;;  %v1387_v14 = vsel %vm195_vm2, %v2566_v4, %v2851_v1  ;;  %v1386_v15 = vsel %vm195_vm2, %v2565_v3, %v2850_v2  ;;  %v2934_v4 = vld [vmem:[%s3979_s3 + $0x28] sm:$0xff]  }
  0xaa   :  { %v2866_v60 = vunpack.i.h.bf16 %v2864_v59  ;;  %v2865_v61 = vunpack.i.l.bf16 %v2864_v59  ;;  %v2859_v62 = vpop.permute.xlu0 %2858  ;;  %2683 = vmatpush3.bf16.msra.mxu0 %v2922_v42 }
  0xab   :  { %v2861_v7 = vunpack.i.h.bf16 %v2859_v62  ;;  %v2860_v8 = vunpack.i.l.bf16 %v2859_v62  ;;  %2684 = vmatprep.subr.bf16.mxu0 %v2923_v44  ;;  %v2930_v62 = vld [vmem:[%s3979_s3 + $0x20] sm:$0xff]  }
  0xac   :  { %v214_v5 = vsel %vm209_vm4, %v207_v63, %v2865_v61  ;;  %v215_v6 = vsel %vm209_vm4, %v208_v0, %v2866_v60  ;;  %v2932_v0 = vld [vmem:[%s3979_s3 + $0x68] sm:$0xff]  }
  0xad   :  { %v218_v9 = vpack.c.bf16 %v215_v6, %v214_v5  ;;  %v2874_v10 = vpop.permute.xlu1 %2873  ;;  %v1392_v20 = vsel %vm202_vm3, %v1386_v15, %v2860_v8  ;;  %v1393_v21 = vsel %vm202_vm3, %v1387_v14, %v2861_v7  ;;  %v2936_v6 = vld [vmem:[%s3979_s3 + $0x70] sm:$0xff]  }
  0xae   :  { %v2869_v11 = vpop.permute.xlu0 %2868  ;;  %v2876_v12 = vunpack.i.h.bf16 %v2874_v10  ;;  %v2875_v13 = vunpack.i.l.bf16 %v2874_v10  ;;  %2685 = vmatpush3.bf16.msra.mxu0 %v2924_v48 }
  0xaf   :  { %v2871_v16 = vunpack.i.h.bf16 %v2869_v11  ;;  %v2870_v17 = vunpack.i.l.bf16 %v2869_v11  ;;  %2751 = vmatmul.mubr.msk.bf16.gmra.mrb[8].mxu0 %vm234_vm5, %v218_v9  ;;  %2686 = vmatprep.subr.bf16.mxu0 %v2925_v50 }
  0xb0   :  { %v1389_v26 = vsel %vm195_vm2, %v2568_v19, %v2876_v12  ;;  %v1388_v27 = vsel %vm195_vm2, %v2567_v18, %v2875_v13 }
  0xb1   :  { %v1398_v22 = vsel %vm209_vm4, %v1392_v20, %v2870_v17  ;;  %v1399_v23 = vsel %vm209_vm4, %v1393_v21, %v2871_v16  ;;  %v2884_v24 = vpop.permute.xlu1 %2883  ;;  %v2938_v16 = vld [vmem:[%s3979_s3 + $0x30] sm:$0xff]  }
  0xb2   :  { %v1403_v25 = vpack.c.bf16 %v1399_v23, %v1398_v22  ;;  %v2879_v28 = vpop.permute.xlu0 %2878  ;;  %v2886_v32 = vunpack.i.h.bf16 %v2884_v24  ;;  %v2885_v33 = vunpack.i.l.bf16 %v2884_v24  ;;  %2687 = vmatpush3.bf16.msra.mxu0 %v2926_v55 }
  0xb3   :  { %v2881_v29 = vunpack.i.h.bf16 %v2879_v28  ;;  %v2880_v31 = vunpack.i.l.bf16 %v2879_v28  ;;  %2688 = vmatprep.subr.bf16.mxu0 %v2928_v57 }
  0xb4   :  { %2761 = vmatmul.mubr.msk.bf16.gmra.mrb[4].mxu1 %vm234_vm5, %v1403_v25 }
  0xb5   :  { %v1395_v34 = vsel %vm202_vm3, %v1389_v26, %v2881_v29  ;;  %v1394_v35 = vsel %vm202_vm3, %v1388_v27, %v2880_v31  ;;  %2764 = vmatprep.mubr.msk.bf16.mxu1 %vm3125_vm0, %v3124_v30  ;;  %v2927_v30 = vld [vmem:[%s3979_s3 + $0x40] sm:$0xff]  }
  0xb6   :  { %v1400_v36 = vsel %vm209_vm4, %v1394_v35, %v2885_v33  ;;  %v1401_v37 = vsel %vm209_vm4, %v1395_v34, %v2886_v32  ;;  %2712 = vmatprep.subr.bf16.mxu1 %v2927_v30  ;;  %2689 = vmatpush3.bf16.msra.mxu0 %v2930_v62 }
  0xb7   :  { %v1404_v38 = vpack.c.bf16 %v1401_v37, %v1400_v36  ;;  %2713 = vmatpush3.bf16.msra.mxu1 %v2929_v43  ;;  %2690 = vmatprep.subr.bf16.mxu0 %v2932_v0 }
  0xb8   :  { %2714 = vmatprep.subr.bf16.mxu1 %v2931_v45 }
  0xba   :  { %2691 = vmatpush3.bf16.msra.mxu0 %v2934_v4 }
  0xbb   :  { %2715 = vmatpush3.bf16.msra.mxu1 %v2933_v46  ;;  %2692 = vmatprep.subr.bf16.mxu0 %v2936_v6 }
  0xbc   :  { %2765 = vmatmul.mubr.msk.bf16.gmra.mrb[8].mxu1 %vm234_vm5, %v1404_v38  ;;  %2716 = vmatprep.subr.bf16.mxu1 %v2935_v47 }
  0xbe   :  { %2693 = vmatpush3.bf16.msra.mxu0 %v2938_v16 }
  0xbf   :  { %2717 = vmatpush3.bf16.msra.mxu1 %v2937_v51 }
 0x170   :  { %v278_v52 = vpop.f32.mrb[0].mxu0 }
 0x171   :  { %v3476_v53 = vadd.f32 %v3467_v49, %v278_v52  ;;  %v2744_v54 = vpop.f32.mrb[1].mxu0 }
 0x172   :  { %v281_v56 = vpop.f32.mrb[2].mxu0 }
 0x173   :  { %v3485_v58 = vadd.f32 %v3467_v49, %v281_v56  ;;  %v2745_v59 = vpop.f32.mrb[3].mxu0  ;;  %v301_v60 = vsel %vm62_vm1, %v3476_v53, 0.0 }
 0x175   :  { %v302_v61 = vsel %vm62_vm1, %v3485_v58, 0.0 }
 0x176   :  { %v303_v63 = vadd.f32 %v302_v61, %v301_v60 }
 0x178   :  { %v286_v1 = vpop.f32.mrb[4].mxu0 }
 0x179   :  { %v3498_v2 = vadd.f32 %v3467_v49, %v286_v1  ;;  %v2748_v3 = vpop.f32.mrb[5].mxu0 }
 0x17a   :  { %v289_v5 = vpop.f32.mrb[6].mxu0 }
 0x17b   :  { %v304_v7 = vsel %vm62_vm1, %v3498_v2, 0.0  ;;  %v290_v8 = vadd.f32 %v3467_v49, %v289_v5  ;;  %v2749_v9 = vpop.f32.mrb[7].mxu0  ;;  %v1463_v10 = vpop.f32.mrb[0].mxu1 }
 0x17c   :  { %v305_v11 = vadd.f32 %v304_v7, %v303_v63  ;;  %v3510_v12 = vadd.f32 %v3467_v49, %v1463_v10  ;;  %v2758_v13 = vpop.f32.mrb[1].mxu1 }
 0x17d   :  { %v306_v14 = vsel %vm62_vm1, %v290_v8, 0.0  ;;  %v1466_v15 = vpop.f32.mrb[2].mxu1 }
 0x17e   :  { %v307_v17 = vadd.f32 %v306_v14, %v305_v11  ;;  %v3517_v18 = vadd.f32 %v3467_v49, %v1466_v15  ;;  %v2759_v19 = vpop.f32.mrb[3].mxu1  ;;  %v1486_v20 = vsel %vm62_vm1, %v3510_v12, 0.0 }
 0x180   :  { %v1487_v21 = vsel %vm62_vm1, %v3517_v18, 0.0 }
 0x181   :  { %v1488_v22 = vadd.f32 %v1487_v21, %v1486_v20 }
 0x182   :  { %v294_v23 = vpop.f32.mrb[8].mxu0 }
 0x183   :  { %v295_v24 = vadd.f32 %v3467_v49, %v294_v23  ;;  %v2752_v25 = vpop.f32.mrb[9].mxu0 }
 0x184   :  { %v297_v26 = vpop.f32.mrb[10].mxu0 }
 0x185   :  { %v308_v27 = vsel %vm62_vm1, %v295_v24, 0.0  ;;  %v298_v28 = vadd.f32 %v3467_v49, %v297_v26  ;;  %v2753_v29 = vpop.f32.mrb[11].mxu0 }
 0x186   :  { %v309_v31 = vadd.f32 %v308_v27, %v307_v17 }
 0x187   :  { %v310_v32 = vsel %vm62_vm1, %v298_v28, 0.0  ;;  %v1471_v33 = vpop.f32.mrb[4].mxu1 }
 0x188   :  { %v311_v34 = vadd.f32 %v310_v32, %v309_v31  ;;  %v1472_v35 = vadd.f32 %v3467_v49, %v1471_v33  ;;  %v2762_v36 = vpop.f32.mrb[5].mxu1 }
 0x189   :  { %v1474_v37 = vpop.f32.mrb[6].mxu1 }
 0x18a   :  { %v312_v38 = vrot.slane %v311_v34, 4  ;;  %v1489_v39 = vsel %vm62_vm1, %v1472_v35, 0.0  ;;  %v1475_v40 = vadd.f32 %v3467_v49, %v1474_v37  ;;  %v2763_v41 = vpop.f32.mrb[7].mxu1 }
 0x18b   :  { %v1490_v30 = vadd.f32 %v1489_v39, %v1488_v22 }
 0x18c   :  { %v313_v42 = vadd.f32 %v312_v38, %v311_v34  ;;  %v1491_v43 = vsel %vm62_vm1, %v1475_v40, 0.0 }
 0x18d   :  { %v1492_v44 = vadd.f32 %v1491_v43, %v1490_v30 }
 0x18e   :  { %v314_v45 = vrot.slane %v313_v42, 2 }
 0x18f   :  { %v1479_v46 = vpop.f32.mrb[8].mxu1 }
 0x190   :  { %v315_v47 = vadd.f32 %v314_v45, %v313_v42  ;;  %v1480_v48 = vadd.f32 %v3467_v49, %v1479_v46  ;;  %v2766_v50 = vpop.f32.mrb[9].mxu1 }
 0x191   :  { %v1482_v51 = vpop.f32.mrb[10].mxu1 }
 0x192   :  { %v316_v52 = vrot.slane %v315_v47, 1  ;;  %v1493_v54 = vsel %vm62_vm1, %v1480_v48, 0.0  ;;  %v1483_v55 = vadd.f32 %v3467_v49, %v1482_v51  ;;  %v2767_v56 = vpop.f32.mrb[11].mxu1 }
 0x193   :  { %v1494_v57 = vadd.f32 %v1493_v54, %v1492_v44 }
 0x194   :  { %v317_v59 = vadd.f32 %v316_v52, %v315_v47  ;;  %v1495_v60 = vsel %vm62_vm1, %v1483_v55, 0.0 }
 0x195   :  { %v1496_v61 = vadd.f32 %v1495_v60, %v1494_v57 }
 0x196   :  { %v319_v62 = vmul.f32 0.020833334, %v317_v59 }
 0x197   :  { %v1497_v63 = vrot.slane %v1496_v61, 4 }
 0x198   :  { %v3536_v0 = vsub.f32 %v3476_v53, %v319_v62  ;;  %v3539_v1 = vsub.f32 %v3485_v58, %v319_v62  ;;  %v3542_v3 = vsub.f32 %v3498_v2, %v319_v62  ;;  %v3544_v4 = vsub.f32 %v290_v8, %v319_v62 }
 0x199   :  { %v3546_v49 = vsub.f32 %v295_v24, %v319_v62  ;;  %v3548_v5 = vsub.f32 %v298_v28, %v319_v62  ;;  %v1498_v6 = vadd.f32 %v1497_v63, %v1496_v61 }
 0x19a   :  { %v326_v7 = vmul.f32 %v3536_v0, %v3536_v0  ;;  %v327_v53 = vmul.f32 %v3539_v1, %v3539_v1  ;;  %v328_v58 = vmul.f32 %v3542_v3, %v3542_v3  ;;  %v329_v2 = vmul.f32 %v3544_v4, %v3544_v4 }
 0x19b   :  { %v1499_v9 = vrot.slane %v1498_v6, 2  ;;  %v330_v14 = vmul.f32 %v3546_v49, %v3546_v49  ;;  %v331_v19 = vmul.f32 %v3548_v5, %v3548_v5 }
 0x19c   :  { %v332_v8 = vsel %vm62_vm1, %v326_v7, 0.0  ;;  %v333_v10 = vsel %vm62_vm1, %v327_v53, 0.0  ;;  %v335_v15 = vsel %vm62_vm1, %v328_v58, 0.0  ;;  %v337_v20 = vsel %vm62_vm1, %v329_v2, 0.0 }
 0x19d   :  { %v334_v11 = vadd.f32 %v333_v10, %v332_v8  ;;  %v1500_v13 = vadd.f32 %v1499_v9, %v1498_v6  ;;  %v339_v23 = vsel %vm62_vm1, %v330_v14, 0.0  ;;  %v341_v26 = vsel %vm62_vm1, %v331_v19, 0.0 }
 0x19f   :  { %v336_v16 = vadd.f32 %v335_v15, %v334_v11  ;;  %v1501_v17 = vrot.slane %v1500_v13, 1 }
 0x1a1   :  { %v338_v21 = vadd.f32 %v337_v20, %v336_v16  ;;  %v1502_v22 = vadd.f32 %v1501_v17, %v1500_v13 }
 0x1a3   :  { %v340_v24 = vadd.f32 %v339_v23, %v338_v21  ;;  %v1503_v25 = vmul.f32 0.020833334, %v1502_v22  ;;  %v2939_v22 = vld [vmem:[%s3979_s3 + $0x58] sm:$0xff]  }
 0x1a4   :  { %v2940_v23 = vld [vmem:[%s3979_s3 + $0x78] sm:$0xff]   ;;  %2718 = vmatprep.subr.bf16.mxu1 %v2939_v22 }
 0x1a5   :  { %v342_v27 = vadd.f32 %v341_v26, %v340_v24  ;;  %v3569_v28 = vsub.f32 %v3510_v12, %v1503_v25  ;;  %v3572_v29 = vsub.f32 %v3517_v18, %v1503_v25  ;;  %v3574_v31 = vsub.f32 %v1472_v35, %v1503_v25  ;;  %v2941_v24 = vld [vmem:[%s3979_s3 + $0x18] sm:$0xff]   ;;  %2694 = vmatprep.subr.bf16.mxu0 %v2940_v23  ;;  %v2943_v26 = vld [vmem:[%s3979_s3 + $0x60] sm:$0xff]  }
 0x1a6   :  { %v3576_v32 = vsub.f32 %v1475_v40, %v1503_v25  ;;  %v3578_v33 = vsub.f32 %v1480_v48, %v1503_v25  ;;  %v3580_v34 = vsub.f32 %v1483_v55, %v1503_v25  ;;  %v2942_v25 = vld [vmem:[%s3979_s3 + $0x38] sm:$0xff]   ;;  %2719 = vmatpush3.bf16.msra.mxu1 %v2941_v24 }
 0x1a7   :  { %v343_v36 = vrot.slane %v342_v27, 4  ;;  %v1510_v37 = vmul.f32 %v3569_v28, %v3569_v28  ;;  %v1511_v38 = vmul.f32 %v3572_v29, %v3572_v29  ;;  %v1512_v12 = vmul.f32 %v3574_v31, %v3574_v31  ;;  %2695 = vmatpush3.bf16.msra.mxu0 %v2942_v25  ;;  %2720 = vmatprep.subr.bf16.mxu1 %v2943_v26 }
 0x1a8   :  { %v1513_v35 = vmul.f32 %v3576_v32, %v3576_v32  ;;  %v1514_v42 = vmul.f32 %v3578_v33, %v3578_v33  ;;  %v1515_v46 = vmul.f32 %v3580_v34, %v3580_v34 }
 0x1a9   :  { %v344_v18 = vadd.f32 %v343_v36, %v342_v27  ;;  %v1516_v39 = vsel %vm62_vm1, %v1510_v37, 0.0  ;;  %v1517_v40 = vsel %vm62_vm1, %v1511_v38, 0.0  ;;  %v1519_v43 = vsel %vm62_vm1, %v1512_v12, 0.0  ;;  %v2944_v27 = vld [vmem:[%s3979_s3 + $0x20] sm:$0xff]   ;;  %v2945_v36 = vld [vmem:[%s3979_s3 + $0x68] sm:$0xff]  }
 0x1aa   :  { %v1518_v41 = vadd.f32 %v1517_v40, %v1516_v39  ;;  %v1521_v47 = vsel %vm62_vm1, %v1513_v35, 0.0  ;;  %v1523_v51 = vsel %vm62_vm1, %v1514_v42, 0.0  ;;  %v1525_v55 = vsel %vm62_vm1, %v1515_v46, 0.0  ;;  %2721 = vmatpush3.bf16.msra.mxu1 %v2944_v27  ;;  %v2946_v42 = vld [vmem:[%s3979_s3 + $0x28] sm:$0xff]  }
 0x1ab   :  { %v345_v30 = vrot.slane %v344_v18, 2  ;;  %2722 = vmatprep.subr.bf16.mxu1 %v2945_v36 }
 0x1ac   :  { %v1520_v44 = vadd.f32 %v1519_v43, %v1518_v41 }
 0x1ad   :  { %v346_v45 = vadd.f32 %v345_v30, %v344_v18 }
 0x1ae   :  { %v1522_v48 = vadd.f32 %v1521_v47, %v1520_v44  ;;  %2723 = vmatpush3.bf16.msra.mxu1 %v2946_v42 }
 0x1af   :  { %v347_v50 = vrot.slane %v346_v45, 1 }
 0x1b0   :  { %v1524_v52 = vadd.f32 %v1523_v51, %v1522_v48 }
 0x1b1   :  { %v348_v54 = vadd.f32 %v347_v50, %v346_v45 }
 0x1b2   :  { %v1526_v56 = vadd.f32 %v1525_v55, %v1524_v52 }
 0x1b3   :  { %v349_v57 = vmul.f32 0.020833334, %v348_v54 }
 0x1b4   :  { %v1527_v59 = vrot.slane %v1526_v56, 4 }
 0x1b5   :  { %v350_v60 = vadd.f32 1e-05, %v349_v57  ;;  %v2948_v57 = vld [vmem:[%s3979_s3 + $0x30] sm:$0xff]  }
 0x1b6   :  { %v1528_v61 = vadd.f32 %v1527_v59, %v1526_v56  ;;  %v2947_v56 = vld [vmem:[%s3979_s3 + $0x70] sm:$0xff]  }
 0x1b7   :  { %3047 = vrsqrt.f32 %v350_v60  ;;  %2724 = vmatprep.subr.bf16.mxu1 %v2947_v56 }
 0x1b8   :  { %v1529_v62 = vrot.slane %v1528_v61, 2  ;;  %2725 = vmatpush3.bf16.msra.mxu1 %v2948_v57  ;;  %v2953_v57 = vld [vmem:[%s3981_s5 + $0x4] ss:$8 sps:$4 sm:$0xff]  }
 0x1b9   :  { %1081 = vmatprep.subr.bf16.mxu0 %v2953_v57 }
 0x1ba   :  { %v1530_v63 = vadd.f32 %v1529_v62, %v1528_v61 }
 0x1bc   :  { %v1531_v6 = vrot.slane %v1530_v63, 1 }
 0x1be   :  { %v1532_v7 = vadd.f32 %v1531_v6, %v1530_v63 }
 0x1c0   :  { %v1533_v53 = vmul.f32 0.020833334, %v1532_v7 }
 0x1c1   :  { %v3048_v58 = vpop.eup %3047 }
 0x1c2   :  { %v352_v9 = vmul.f32 %v3048_v58, %v3536_v0  ;;  %v353_v2 = vmul.f32 %v3048_v58, %v3539_v1  ;;  %v354_v8 = vmul.f32 %v3048_v58, %v3542_v3  ;;  %v355_v10 = vmul.f32 %v3048_v58, %v3544_v4 }
 0x1c3   :  { %v356_v11 = vmul.f32 %v3048_v58, %v3546_v49  ;;  %v357_v13 = vmul.f32 %v3048_v58, %v3548_v5  ;;  %v1534_v14 = vadd.f32 1e-05, %v1533_v53  ;;  %v2949_v53 = vld [vmem:[%s3979_s3 + $0x78] sm:$0xff]  }
 0x1c4   :  { %vm358_vm6 = vcmp.ge.f32.partialorder %v352_v9, 0.0  ;;  %vm359_vm7 = vcmp.ge.f32.partialorder %v353_v2, 0.0  ;;  %vm360_vm8 = vcmp.ge.f32.partialorder %v354_v8, 0.0  ;;  %vm361_vm9 = vcmp.ge.f32.partialorder %v355_v10, 0.0  ;;  %2726 = vmatprep.subr.bf16.mxu1 %v2949_v53  ;;  %v2950_v58 = vld [vmem:[%s3979_s3 + $0x38] sm:$0xff]  }
 0x1c5   :  { %vm362_vm10 = vcmp.ge.f32.partialorder %v356_v11, 0.0  ;;  %vm363_vm11 = vcmp.ge.f32.partialorder %v357_v13, 0.0  ;;  %v364_v15 = vmul.f32 0.2, %v352_v9  ;;  %v365_v16 = vmul.f32 0.2, %v353_v2  ;;  %2727 = vmatpush3.bf16.msra.mxu1 %v2950_v58 }
 0x1c6   :  { %v366_v0 = vmul.f32 0.2, %v354_v8  ;;  %v367_v17 = vmul.f32 0.2, %v355_v10  ;;  %v368_v1 = vmul.f32 0.2, %v356_v11  ;;  %3049 = vrsqrt.f32 %v1534_v14  ;;  %2244 = vmatprep.subr.bf16.mxu1 %v2953_v57 }
 0x1c7   :  { %v369_v3 = vmul.f32 0.2, %v357_v13  ;;  %v370_v19 = vsel %vm358_vm6, %v352_v9, %v364_v15  ;;  %v371_v4 = vsel %vm359_vm7, %v353_v2, %v365_v16  ;;  %v2965_v53 = vld [vmem:[%s3981_s5 + $0x44] ss:$8 sps:$4 sm:$0xff]   ;;  %v2963_v58 = vld [vmem:[%s3981_s5 + $0x40] ss:$8 sps:$4 sm:$0xff]  }
 0x1c8   :  { %v372_v20 = vsel %vm360_vm8, %v354_v8, %v366_v0  ;;  %v373_v49 = vsel %vm361_vm9, %v355_v10, %v367_v17  ;;  %v374_v21 = vsel %vm362_vm10, %v356_v11, %v368_v1  ;;  %376 = vst.msk [vmem:[#allocation2 + $0x8] sm:$0xff] %vm62_vm1, %v370_v19  ;;  %377 = vst.msk [vmem:[#allocation2 + $0x10] sm:$0xff] %vm62_vm1, %v371_v4  ;;  %vm1167_vm8 = vcmask 1043456  }
 0x1c9   :  { %v375_v5 = vsel %vm363_vm11, %v357_v13, %v369_v3  ;;  %378 = vst.msk [vmem:[#allocation2 + $0x18] sm:$0xff] %vm62_vm1, %v372_v20  ;;  %379 = vst.msk [vmem:[#allocation2 + $0x20] sm:$0xff] %vm62_vm1, %v373_v49 }
 0x1ca   :  { %380 = vst.msk [vmem:[#allocation2 + $0x28] sm:$0xff] %vm62_vm1, %v374_v21  ;;  %381 = vst.msk [vmem:[#allocation2 + $0x30] sm:$0xff] %vm62_vm1, %v375_v5 }
 0x1cf   :  { %v389_v37 = vld [vmem:[#allocation2 + $0x8] ss:$2 sm:$0xff] }
 0x1d0   :  { %v3050_v38 = vpop.eup %3049  ;;  %v401_v12 = vld [vmem:[#allocation2 + $0xa] ss:$2 sm:$0xff]  ;;  %v397_v55 = vld [vmem:[#allocation2 + $0x19] ss:$2 sm:$0xff] }
 0x1d1   :  { %v403_v18 = vld [vmem:[#allocation2 + $0x1a] ss:$2 sm:$0xff]  ;;  %v1536_v35 = vmul.f32 %v3050_v38, %v3569_v28  ;;  %v1537_v39 = vmul.f32 %v3050_v38, %v3572_v29  ;;  %v1538_v40 = vmul.f32 %v3050_v38, %v3574_v31  ;;  %v1539_v41 = vmul.f32 %v3050_v38, %v3576_v32  ;;  %v385_v31 = vld [vmem:[#allocation2 + $0x17] ss:$2 sm:$0xff]  ;;  %v3644_v50 = vld [vmem:[#allocation2 + $0x27] ss:$2 sm:$0xff] }
 0x1d2   :  { %v391_v30 = vld [vmem:[#allocation2 + $0x18] ss:$2 sm:$0xff]  ;;  %v1540_v43 = vmul.f32 %v3050_v38, %v3578_v33  ;;  %v1541_v44 = vmul.f32 %v3050_v38, %v3580_v34  ;;  %v2887_v45 = vpack.i.bf16 %v403_v18, %v401_v12  ;;  %v395_v32 = vld [vmem:[#allocation2 + $0x9] ss:$2 sm:$0xff]  ;;  %v393_v62 = vld [vmem:[#allocation2 + $0x28] ss:$2 sm:$0xff] }
 0x1d3   :  { %v2892_v46 = vpack.i.bf16 %v391_v30, %v389_v37  ;;  %vm1542_vm12 = vcmp.ge.f32.partialorder %v1536_v35, 0.0  ;;  %vm1543_vm13 = vcmp.ge.f32.partialorder %v1537_v39, 0.0  ;;  %vm1544_vm14 = vcmp.ge.f32.partialorder %v1538_v40, 0.0  ;;  %v383_v33 = vld [vmem:[#allocation2 + $0x7] ss:$2 sm:$0xff] }
 0x1d4   :  { %vm1545_vm15 = vcmp.ge.f32.partialorder %v1539_v41, 0.0  ;;  %vm1546_vm0 = vcmp.ge.f32.partialorder %v1540_v43, 0.0  ;;  %vm1547_vm2 = vcmp.ge.f32.partialorder %v1541_v44, 0.0  ;;  %v1548_v28 = vmul.f32 0.2, %v1536_v35  ;;  %2888 = vrot.lane.b32.xlu0 %v2887_v45, %s3126_s23 }
 0x1d5   :  { %v1549_v29 = vmul.f32 0.2, %v1537_v39  ;;  %2893 = vrot.lane.b32.xlu1 %v2892_v46, %s3126_s23  ;;  %v1550_v47 = vmul.f32 0.2, %v1538_v40  ;;  %v1551_v34 = vmul.f32 0.2, %v1539_v41 }
 0x1d6   :  { %v1552_v48 = vmul.f32 0.2, %v1540_v43  ;;  %v1553_v51 = vmul.f32 0.2, %v1541_v44  ;;  %v1554_v52 = vsel %vm1542_vm12, %v1536_v35, %v1548_v28  ;;  %v399_v63 = vld [vmem:[#allocation2 + $0x29] ss:$2 sm:$0xff] }
 0x1d7   :  { %v1555_v54 = vsel %vm1543_vm13, %v1537_v39, %v1549_v29  ;;  %v1556_v59 = vsel %vm1544_vm14, %v1538_v40, %v1550_v47  ;;  %v1557_v60 = vsel %vm1545_vm15, %v1539_v41, %v1551_v34  ;;  %1560 = vst.msk [vmem:[#allocation2 + $0x8] sm:$0xff] %vm62_vm1, %v1554_v52  ;;  %v405_v6 = vld [vmem:[#allocation2 + $0x2a] ss:$2 sm:$0xff] }
 0x1d8   :  { %v1558_v61 = vsel %vm1546_vm0, %v1540_v43, %v1552_v48  ;;  %1561 = vst.msk [vmem:[#allocation2 + $0x10] sm:$0xff] %vm62_vm1, %v1555_v54  ;;  %v1559_v7 = vsel %vm1547_vm2, %v1541_v44, %v1553_v51  ;;  %1562 = vst.msk [vmem:[#allocation2 + $0x18] sm:$0xff] %vm62_vm1, %v1556_v59  ;;  %v2951_v59 = vld [vmem:[%s3981_s5] ss:$8 sps:$4 sm:$0xff]   ;;  %vm2425_vm2 = vcmask 7168  }
 0x1d9   :  { %1563 = vst.msk [vmem:[#allocation2 + $0x20] sm:$0xff] %vm62_vm1, %v1557_v60  ;;  %1564 = vst.msk [vmem:[#allocation2 + $0x28] sm:$0xff] %vm62_vm1, %v1558_v61  ;;  %v2956_v60 = vld [vmem:[%s3981_s5 + $0x14] ss:$8 sps:$4 sm:$0xff]   ;;  %v2954_v61 = vld [vmem:[%s3981_s5 + $0x10] ss:$8 sps:$4 sm:$0xff]  }
 0x1da   :  { %1565 = vst.msk [vmem:[#allocation2 + $0x30] sm:$0xff] %vm62_vm1, %v1559_v7  ;;  %v2960_v7 = vld [vmem:[%s3981_s5 + $0x30] ss:$8 sps:$4 sm:$0xff]  }
 0x1df   :  { %v1575_v2 = vld [vmem:[#allocation2 + $0xa] ss:$2 sm:$0xff]  ;;  %v1572_v12 = vld [vmem:[#allocation2 + $0x9] ss:$2 sm:$0xff] }
 0x1e0   :  { %v1576_v9 = vld [vmem:[#allocation2 + $0x1a] ss:$2 sm:$0xff]  ;;  %v2897_v10 = vpack.i.bf16 %v1575_v2, %v405_v6  ;;  %v1573_v18 = vld [vmem:[#allocation2 + $0x19] ss:$2 sm:$0xff] }
 0x1e1   :  { %v2902_v8 = vpack.i.bf16 %v393_v62, %v1576_v9  ;;  %v1569_v11 = vld [vmem:[#allocation2 + $0x8] ss:$2 sm:$0xff]  ;;  %v1570_v15 = vld [vmem:[#allocation2 + $0x18] ss:$2 sm:$0xff]  ;;  %v1568_v54 = vld [vmem:[#allocation2 + $0x27] ss:$2 sm:$0xff] }
 0x1e2   :  { %v1571_v13 = vld [vmem:[#allocation2 + $0x28] ss:$2 sm:$0xff]  ;;  %2898 = vrot.lane.b32.xlu0 %v2897_v10, %s3126_s23  ;;  %v2907_v0 = vpack.i.bf16 %v1570_v15, %v1569_v11 }
 0x1e3   :  { %v1577_v14 = vld [vmem:[#allocation2 + $0x2a] ss:$2 sm:$0xff]  ;;  %2903 = vrot.lane.b32.xlu1 %v2902_v8, %s3126_s23 }
 0x1e4   :  { %v2912_v16 = vpack.i.bf16 %v1571_v13, %v1577_v14  ;;  %v2959_v62 = vld [vmem:[%s3981_s5 + $0x24] ss:$8 sps:$4 sm:$0xff]   ;;  %v2962_v6 = vld [vmem:[%s3981_s5 + $0x34] ss:$8 sps:$4 sm:$0xff]   ;;  %v2966_v2 = vld [vmem:[%s3981_s5 + $0x50] ss:$8 sps:$4 sm:$0xff]  }
 0x1e5   :  { %v2968_v9 = vld [vmem:[%s3981_s5 + $0x54] ss:$8 sps:$4 sm:$0xff]   ;;  %v2971_v8 = vld [vmem:[%s3981_s5 + $0x64] ss:$8 sps:$4 sm:$0xff]   ;;  %v2969_v10 = vld [vmem:[%s3981_s5 + $0x60] ss:$8 sps:$4 sm:$0xff]  }
 0x1e6   :  { %2908 = vrot.lane.b32.xlu0 %v2907_v0, %s3126_s23  ;;  %v2974_v11 = vld [vmem:[%s3981_s5 + $0x74] ss:$8 sps:$4 sm:$0xff]   ;;  %v2972_v13 = vld [vmem:[%s3981_s5 + $0x70] ss:$8 sps:$4 sm:$0xff]   ;;  %v2977_v14 = vld [vmem:[%s3981_s5 + $0x84] ss:$8 sps:$4 sm:$0xff]  }
 0x1e7   :  { %2913 = vrot.lane.b32.xlu1 %v2912_v16, %s3126_s23  ;;  %v2975_v15 = vld [vmem:[%s3981_s5 + $0x80] ss:$8 sps:$4 sm:$0xff]   ;;  %v2980_v16 = vld [vmem:[%s3981_s5 + $0x94] ss:$8 sps:$4 sm:$0xff]   ;;  %v2978_v0 = vld [vmem:[%s3981_s5 + $0x90] ss:$8 sps:$4 sm:$0xff]  }
 0x1e8   :  { %s3127_s23 = smov [#allocation9]  }
 0x1e9   :  { %s2443_s24 = sshll.u32 %s3127_s23, 4  ;;  %s2444_s24 = int_to_ptr.vmem [resolvable:$true] %s2443_s24 }
 0x1ea   :  { %s3091_s26 = scalar_lea.vmem %s2444_s24, 16  ;;  %s3095_s27 = scalar_lea.vmem %s2444_s24, 32 }
 0x1eb   :  { %p3092_p10 = scmp.ne.s32.totalorder %s2444_s24, %s3091_s26  ;;  %p3096_p11 = scmp.lt.s32.totalorder %s2444_s24, %s2444_s24 }
 0x1ec   :  { %p3097_p12 = scmp.lt.s32.totalorder %s3095_s27, %s3091_s26 }
 0x1ee   :  { %p3098_p13 = por %p3097_p12, %p3096_p11 }
 0x1f0   :  { %p3099_p0 = pnand %p3098_p13, %p3092_p10 }
 0x246   :  { %v2889_v17 = vpop.permute.xlu0 %2888 }
 0x247   :  { %v2894_v1 = vpop.permute.xlu1 %2893  ;;  %v2891_v3 = vunpack.i.h.bf16 %v2889_v17  ;;  %v2890_v19 = vunpack.i.l.bf16 %v2889_v17  ;;  %v2983_v17 = vld [vmem:[%s3981_s5 + $0xa4] ss:$8 sps:$4 sm:$0xff]  }
 0x248   :  { %v2896_v4 = vunpack.i.h.bf16 %v2894_v1  ;;  %v2895_v20 = vunpack.i.l.bf16 %v2894_v1  ;;  %v2981_v1 = vld [vmem:[%s3981_s5 + $0xa0] ss:$8 sps:$4 sm:$0xff]  }
 0x249   :  { %v433_v5 = vsel %vm62_vm1, %v395_v32, %v2890_v19  ;;  %v434_v22 = vsel %vm62_vm1, %v397_v55, %v2891_v3  ;;  %v1566_v32 = vld [vmem:[#allocation2 + $0x7] ss:$2 sm:$0xff] }
 0x24a   :  { %v431_v49 = vsel %vm62_vm1, %v385_v31, %v2896_v4  ;;  %v430_v21 = vsel %vm62_vm1, %v383_v33, %v2895_v20  ;;  %v437_v24 = vpack.c.bf16 %v434_v22, %v433_v5  ;;  %v1567_v31 = vld [vmem:[#allocation2 + $0x17] ss:$2 sm:$0xff] }
 0x24b   :  { %v436_v23 = vpack.c.bf16 %v431_v49, %v430_v21  ;;  %v1574_v33 = vld [vmem:[#allocation2 + $0x29] ss:$2 sm:$0xff] }
 0x24c   :  { %607 = vmatprep.mubr.bf16.mxu0 %v437_v24  ;;  %v2986_v3 = vld [vmem:[%s3981_s5 + $0xb4] ss:$8 sps:$4 sm:$0xff]   ;;  %v2984_v19 = vld [vmem:[%s3981_s5 + $0xb0] ss:$8 sps:$4 sm:$0xff]   ;;  %v2989_v4 = vld [vmem:[%s3981_s5 + $0xc4] ss:$8 sps:$4 sm:$0xff]  }
 0x24d   :  { %608 = vmatmul.mubr.bf16.vlgmr.msra.gmra.mrb[12].mxu0 %v436_v23  ;;  %v2987_v20 = vld [vmem:[%s3981_s5 + $0xc0] ss:$8 sps:$4 sm:$0xff]   ;;  %v2992_v49 = vld [vmem:[%s3981_s5 + $0xd4] ss:$8 sps:$4 sm:$0xff]   ;;  %v2990_v21 = vld [vmem:[%s3981_s5 + $0xd0] ss:$8 sps:$4 sm:$0xff]  }
 0x24e   :  { %1082 = vmatpush1.bf16.msra.mxu0 %v2951_v59  ;;  %v2995_v5 = vld [vmem:[%s3981_s5 + $0xe4] ss:$8 sps:$4 sm:$0xff]   ;;  %v2993_v22 = vld [vmem:[%s3981_s5 + $0xe0] ss:$8 sps:$4 sm:$0xff]   ;;  %v2998_v23 = vld [vmem:[%s3981_s5 + $0xf4] ss:$8 sps:$4 sm:$0xff]  }
 0x24f   :  { %1083 = vmatprep.subr.bf16.mxu0 %v2956_v60  ;;  %v2996_v24 = vld [vmem:[%s3981_s5 + $0xf0] ss:$8 sps:$4 sm:$0xff]  }
 0x252   :  { %1084 = vmatpush1.bf16.msra.mxu0 %v2954_v61 }
 0x253   :  { %1085 = vmatprep.subr.bf16.mxu0 %v2959_v62 }
 0x254   :  { %v2899_v26 = vpop.permute.xlu0 %2898 }
 0x255   :  { %v2904_v25 = vpop.permute.xlu1 %2903  ;;  %v2901_v37 = vunpack.i.h.bf16 %v2899_v26  ;;  %v2900_v38 = vunpack.i.l.bf16 %v2899_v26 }
 0x256   :  { %v2906_v27 = vunpack.i.h.bf16 %v2904_v25  ;;  %v2905_v36 = vunpack.i.l.bf16 %v2904_v25  ;;  %v3001_v25 = vld [vmem:[%s3981_s5 + $0x104] ss:$8 sps:$4 sm:$0xff]  }
 0x257   :  { %v435_v35 = vsel %vm62_vm1, %v399_v63, %v2900_v38  ;;  %v1605_v39 = vsel %vm62_vm1, %v1572_v12, %v2901_v37  ;;  %v2957_v63 = vld [vmem:[%s3981_s5 + $0x20] ss:$8 sps:$4 sm:$0xff]  }
 0x258   :  { %v1606_v40 = vsel %vm62_vm1, %v1573_v18, %v2905_v36  ;;  %v432_v41 = vsel %vm62_vm1, %v3644_v50, %v2906_v27  ;;  %v2909_v42 = vpop.permute.xlu0 %2908  ;;  %v439_v43 = vpack.c.bf16 %v435_v35, %v435_v35  ;;  %1086 = vmatpush1.bf16.msra.mxu0 %v2957_v63  ;;  %v2481_v38 = vld [vmem:[%s3980_s4] ss:$0 sm:$0xff] }
 0x259   :  { %v2914_v30 = vpop.permute.xlu1 %2913  ;;  %v1609_v44 = vpack.c.bf16 %v1606_v40, %v1605_v39  ;;  %v438_v45 = vpack.c.bf16 %v432_v41, %v432_v41  ;;  %v2911_v28 = vunpack.i.h.bf16 %v2909_v42  ;;  %v2910_v29 = vunpack.i.l.bf16 %v2909_v42  ;;  %1087 = vmatprep.subr.bf16.mxu0 %v2962_v6 }
 0x25a   :  { %v2915_v46 = vunpack.i.l.bf16 %v2914_v30  ;;  %615 = vmatprep.mubr.bf16.mxu0 %v439_v43  ;;  %v2916_v52 = vunpack.i.h.bf16 %v2914_v30 }
 0x25b   :  { %1779 = vmatprep.mubr.bf16.mxu1 %v1609_v44  ;;  %v1603_v47 = vsel %vm62_vm1, %v1567_v31, %v2911_v28  ;;  %v1602_v34 = vsel %vm62_vm1, %v1566_v32, %v2910_v29  ;;  %616 = vmatmul.mubr.bf16.gmra.mrb[16].mxu0 %v438_v45 }
 0x25c   :  { %v1607_v48 = vsel %vm62_vm1, %v1574_v33, %v2915_v46  ;;  %v1608_v50 = vpack.c.bf16 %v1603_v47, %v1602_v34  ;;  %v1604_v55 = vsel %vm62_vm1, %v1568_v54, %v2916_v52  ;;  %1088 = vmatpush1.bf16.msra.mxu0 %v2960_v7 }
 0x25d   :  { %v1611_v51 = vpack.c.bf16 %v1607_v48, %v1607_v48  ;;  %v1610_v56 = vpack.c.bf16 %v1604_v55, %v1604_v55  ;;  %1089 = vmatprep.subr.bf16.mxu0 %v2965_v53 }
 0x25e   :  { %1780 = vmatmul.mubr.bf16.vlgmr.msra.gmra.mrb[12].mxu1 %v1608_v50 }
 0x25f   :  { %1787 = vmatprep.mubr.bf16.mxu1 %v1611_v51  ;;  %2245 = vmatpush1.bf16.msra.mxu1 %v2951_v59 }
 0x260   :  { %2246 = vmatprep.subr.bf16.mxu1 %v2956_v60  ;;  %1090 = vmatpush1.bf16.msra.mxu0 %v2963_v58 }
 0x261   :  { %1091 = vmatprep.subr.bf16.mxu0 %v2968_v9 }
 0x263   :  { %2247 = vmatpush1.bf16.msra.mxu1 %v2954_v61 }
 0x264   :  { %2248 = vmatprep.subr.bf16.mxu1 %v2959_v62  ;;  %1092 = vmatpush1.bf16.msra.mxu0 %v2966_v2 }
 0x265   :  { %1093 = vmatprep.subr.bf16.mxu0 %v2971_v8 }
 0x266   :  { %1788 = vmatmul.mubr.bf16.gmra.mrb[16].mxu1 %v1610_v56 }
 0x267   :  { %2249 = vmatpush1.bf16.msra.mxu1 %v2957_v63 }
 0x268   :  { %2250 = vmatprep.subr.bf16.mxu1 %v2962_v6  ;;  %1094 = vmatpush1.bf16.msra.mxu0 %v2969_v10 }
 0x269   :  { %1095 = vmatprep.subr.bf16.mxu0 %v2974_v11 }
 0x26b   :  { %2251 = vmatpush1.bf16.msra.mxu1 %v2960_v7 }
 0x26c   :  { %2252 = vmatprep.subr.bf16.mxu1 %v2965_v53  ;;  %1096 = vmatpush1.bf16.msra.mxu0 %v2972_v13 }
 0x26d   :  { %1097 = vmatprep.subr.bf16.mxu0 %v2977_v14 }
 0x26f   :  { %2253 = vmatpush1.bf16.msra.mxu1 %v2963_v58 }
 0x270   :  { %2254 = vmatprep.subr.bf16.mxu1 %v2968_v9  ;;  %1098 = vmatpush1.bf16.msra.mxu0 %v2975_v15 }
 0x271   :  { %1099 = vmatprep.subr.bf16.mxu0 %v2980_v16 }
 0x273   :  { %2255 = vmatpush1.bf16.msra.mxu1 %v2966_v2 }
 0x274   :  { %2256 = vmatprep.subr.bf16.mxu1 %v2971_v8  ;;  %1100 = vmatpush1.bf16.msra.mxu0 %v2978_v0 }
 0x275   :  { %1101 = vmatprep.subr.bf16.mxu0 %v2983_v17 }
 0x277   :  { %2257 = vmatpush1.bf16.msra.mxu1 %v2969_v10 }
 0x278   :  { %2258 = vmatprep.subr.bf16.mxu1 %v2974_v11  ;;  %1102 = vmatpush1.bf16.msra.mxu0 %v2981_v1 }
 0x279   :  { %1103 = vmatprep.subr.bf16.mxu0 %v2986_v3 }
 0x27b   :  { %2259 = vmatpush1.bf16.msra.mxu1 %v2972_v13 }
 0x27c   :  { %2260 = vmatprep.subr.bf16.mxu1 %v2977_v14  ;;  %1104 = vmatpush1.bf16.msra.mxu0 %v2984_v19 }
 0x27d   :  { %1105 = vmatprep.subr.bf16.mxu0 %v2989_v4 }
 0x27f   :  { %2261 = vmatpush1.bf16.msra.mxu1 %v2975_v15 }
 0x280   :  { %2262 = vmatprep.subr.bf16.mxu1 %v2980_v16  ;;  %1106 = vmatpush1.bf16.msra.mxu0 %v2987_v20 }
 0x281   :  { %1107 = vmatprep.subr.bf16.mxu0 %v2992_v49 }
 0x283   :  { %2263 = vmatpush1.bf16.msra.mxu1 %v2978_v0 }
 0x284   :  { %2264 = vmatprep.subr.bf16.mxu1 %v2983_v17  ;;  %1108 = vmatpush1.bf16.msra.mxu0 %v2990_v21 }
 0x285   :  { %1109 = vmatprep.subr.bf16.mxu0 %v2995_v5 }
 0x287   :  { %2265 = vmatpush1.bf16.msra.mxu1 %v2981_v1 }
 0x288   :  { %2266 = vmatprep.subr.bf16.mxu1 %v2986_v3  ;;  %1110 = vmatpush1.bf16.msra.mxu0 %v2993_v22 }
 0x289   :  { %1111 = vmatprep.subr.bf16.mxu0 %v2998_v23 }
 0x28b   :  { %2267 = vmatpush1.bf16.msra.mxu1 %v2984_v19 }
 0x28c   :  { %2268 = vmatprep.subr.bf16.mxu1 %v2989_v4  ;;  %1112 = vmatpush1.bf16.msra.mxu0 %v2996_v24 }
 0x28d   :  { %1124 = vmatprep.subr.bf16.mxu0 %v3001_v25 }
 0x28f   :  { %2269 = vmatpush1.bf16.msra.mxu1 %v2987_v20 }
 0x290   :  { %2270 = vmatprep.subr.bf16.mxu1 %v2992_v49 }
 0x293   :  { %2271 = vmatpush1.bf16.msra.mxu1 %v2990_v21 }
 0x294   :  { %2272 = vmatprep.subr.bf16.mxu1 %v2995_v5 }
 0x297   :  { %2273 = vmatpush1.bf16.msra.mxu1 %v2993_v22 }
 0x298   :  { %2274 = vmatprep.subr.bf16.mxu1 %v2998_v23 }
 0x29b   :  { %2275 = vmatpush1.bf16.msra.mxu1 %v2996_v24 }
 0x29c   :  { %2287 = vmatprep.subr.bf16.mxu1 %v3001_v25 }
 0x320   :  { %v2696_v26 = vpop.f32.mrb[12].mxu0 }
 0x321   :  { %v2697_v27 = vpop.f32.mrb[13].mxu0 }
 0x322   :  { %v2698_v36 = vadd.f32 %v2697_v27, %v2696_v26  ;;  %v2699_v37 = vpop.f32.mrb[14].mxu0 }
 0x323   :  { %v2700_v12 = vpop.f32.mrb[15].mxu0 }
 0x324   :  { %v2701_v18 = vadd.f32 %v2700_v12, %v2699_v37  ;;  %v610_v35 = vadd.f32 %v2698_v36, %v2481_v38 }
 0x326   :  { %v613_v39 = vadd.f32 %v2701_v18, %v2481_v38 }
 0x328   :  { %v623_v40 = vadd.f32 %v613_v39, %v610_v35 }
 0x32e   :  { %v2702_v41 = vpop.f32.mrb[16].mxu0 }
 0x32f   :  { %v2703_v30 = vpop.f32.mrb[17].mxu0 }
 0x330   :  { %v2704_v42 = vadd.f32 %v2703_v30, %v2702_v41  ;;  %v2705_v43 = vpop.f32.mrb[18].mxu0 }
 0x331   :  { %v2706_v44 = vpop.f32.mrb[19].mxu0  ;;  %v2728_v45 = vpop.f32.mrb[12].mxu1 }
 0x332   :  { %v618_v46 = vadd.f32 %v2704_v42, %v2481_v38  ;;  %v2729_v28 = vpop.f32.mrb[13].mxu1 }
 0x333   :  { %v2730_v29 = vadd.f32 %v2729_v28, %v2728_v45  ;;  %v2731_v31 = vpop.f32.mrb[14].mxu1 }
 0x334   :  { %v624_v32 = vadd.f32 %v623_v40, %v618_v46  ;;  %v2732_v33 = vpop.f32.mrb[15].mxu1 }
 0x335   :  { %v2733_v47 = vadd.f32 %v2732_v33, %v2731_v31  ;;  %v1782_v48 = vadd.f32 %v2730_v29, %v2481_v38 }
 0x336   :  { %v625_v34 = vrot.slane %v624_v32, 4 }
 0x337   :  { %v1785_v50 = vadd.f32 %v2733_v47, %v2481_v38 }
 0x338   :  { %v626_v51 = vadd.f32 %v625_v34, %v624_v32 }
 0x339   :  { %v1795_v52 = vadd.f32 %v1785_v50, %v1782_v48  ;;  %v2734_v54 = vpop.f32.mrb[16].mxu1 }
 0x33a   :  { %v627_v55 = vrot.slane %v626_v51, 2  ;;  %v2735_v56 = vpop.f32.mrb[17].mxu1 }
 0x33b   :  { %v2736_v57 = vadd.f32 %v2735_v56, %v2734_v54  ;;  %v2737_v59 = vpop.f32.mrb[18].mxu1 }
 0x33c   :  { %v628_v60 = vadd.f32 %v627_v55, %v626_v51  ;;  %v2738_v61 = vpop.f32.mrb[19].mxu1 }
 0x33d   :  { %v1790_v62 = vadd.f32 %v2736_v57, %v2481_v38 }
 0x33e   :  { %v629_v63 = vrot.slane %v628_v60, 1 }
 0x33f   :  { %v1796_v6 = vadd.f32 %v1795_v52, %v1790_v62 }
 0x340   :  { %v630_v7 = vadd.f32 %v629_v63, %v628_v60 }
 0x341   :  { %v1797_v53 = vrot.slane %v1796_v6, 4 }
 0x342   :  { %v632_v58 = vmul.f32 0.041666668, %v630_v7 }
 0x343   :  { %v1798_v9 = vadd.f32 %v1797_v53, %v1796_v6  ;;  %v2999_v53 = vld [vmem:[%s3981_s5 + $0x100] ss:$8 sps:$4 sm:$0xff]  }
 0x344   :  { %v633_v2 = vsub.f32 %v610_v35, %v632_v58  ;;  %v634_v8 = vsub.f32 %v613_v39, %v632_v58  ;;  %v635_v10 = vsub.f32 %v618_v46, %v632_v58 }
 0x345   :  { %v1799_v11 = vrot.slane %v1798_v9, 2 }
 0x346   :  { %v636_v13 = vmul.f32 %v633_v2, %v633_v2  ;;  %v637_v14 = vmul.f32 %v634_v8, %v634_v8  ;;  %v638_v16 = vmul.f32 %v635_v10, %v635_v10 }
 0x347   :  { %v1800_v15 = vadd.f32 %v1799_v11, %v1798_v9 }
 0x348   :  { %v639_v0 = vadd.f32 %v637_v14, %v636_v13 }
 0x349   :  { %v1801_v17 = vrot.slane %v1800_v15, 1 }
 0x34a   :  { %v640_v1 = vadd.f32 %v639_v0, %v638_v16  ;;  %v3007_v16 = vld [vmem:[%s3981_s5 + $0x124] ss:$8 sps:$4 sm:$0xff]   ;;  %v3005_v0 = vld [vmem:[%s3981_s5 + $0x120] ss:$8 sps:$4 sm:$0xff]  }
 0x34b   :  { %v1802_v3 = vadd.f32 %v1801_v17, %v1800_v15  ;;  %v3002_v15 = vld [vmem:[%s3981_s5 + $0x110] ss:$8 sps:$4 sm:$0xff]  }
 0x34c   :  { %v641_v19 = vrot.slane %v640_v1, 4 }
 0x34d   :  { %v1803_v4 = vmul.f32 0.041666668, %v1802_v3 }
 0x34e   :  { %v642_v20 = vadd.f32 %v641_v19, %v640_v1  ;;  %v3010_v1 = vld [vmem:[%s3981_s5 + $0x134] ss:$8 sps:$4 sm:$0xff]  }
 0x34f   :  { %v1804_v49 = vsub.f32 %v1782_v48, %v1803_v4  ;;  %v1805_v21 = vsub.f32 %v1785_v50, %v1803_v4  ;;  %v1806_v5 = vsub.f32 %v1790_v62, %v1803_v4 }
 0x350   :  { %v643_v22 = vrot.slane %v642_v20, 2 }
 0x351   :  { %v1807_v23 = vmul.f32 %v1804_v49, %v1804_v49  ;;  %v1808_v24 = vmul.f32 %v1805_v21, %v1805_v21  ;;  %v1809_v26 = vmul.f32 %v1806_v5, %v1806_v5 }
 0x352   :  { %v644_v25 = vadd.f32 %v643_v22, %v642_v20  ;;  %v3008_v22 = vld [vmem:[%s3981_s5 + $0x130] ss:$8 sps:$4 sm:$0xff]  }
 0x353   :  { %v1810_v27 = vadd.f32 %v1808_v24, %v1807_v23  ;;  %v3013_v24 = vld [vmem:[%s3981_s5 + $0x144] ss:$8 sps:$4 sm:$0xff]  }
 0x354   :  { %v645_v36 = vrot.slane %v644_v25, 1 }
 0x355   :  { %v1811_v37 = vadd.f32 %v1810_v27, %v1809_v26  ;;  %v3016_v26 = vld [vmem:[%s3981_s5 + $0x154] ss:$8 sps:$4 sm:$0xff]   ;;  %v3014_v27 = vld [vmem:[%s3981_s5 + $0x150] ss:$8 sps:$4 sm:$0xff]  }
 0x356   :  { %v646_v38 = vadd.f32 %v645_v36, %v644_v25  ;;  %v3011_v25 = vld [vmem:[%s3981_s5 + $0x140] ss:$8 sps:$4 sm:$0xff]   ;;  %v3019_v36 = vld [vmem:[%s3981_s5 + $0x164] ss:$8 sps:$4 sm:$0xff]  }
 0x357   :  { %v1812_v12 = vrot.slane %v1811_v37, 4 }
 0x358   :  { %v647_v18 = vmul.f32 0.041666668, %v646_v38  ;;  %v3022_v38 = vld [vmem:[%s3981_s5 + $0x174] ss:$8 sps:$4 sm:$0xff]  }
 0x359   :  { %v1813_v35 = vadd.f32 %v1812_v12, %v1811_v37  ;;  %v3017_v37 = vld [vmem:[%s3981_s5 + $0x160] ss:$8 sps:$4 sm:$0xff]   ;;  %v3020_v12 = vld [vmem:[%s3981_s5 + $0x170] ss:$8 sps:$4 sm:$0xff]  }
 0x35a   :  { %v648_v39 = vadd.f32 1e-05, %v647_v18  ;;  %v3025_v18 = vld [vmem:[%s3981_s5 + $0x184] ss:$8 sps:$4 sm:$0xff]  }
 0x35b   :  { %v1814_v40 = vrot.slane %v1813_v35, 2 }
 0x35c   :  { %3051 = vrsqrt.f32 %v648_v39  ;;  %v3028_v39 = vld [vmem:[%s3981_s5 + $0x194] ss:$8 sps:$4 sm:$0xff]  }
 0x35d   :  { %v1815_v41 = vadd.f32 %v1814_v40, %v1813_v35  ;;  %v3023_v35 = vld [vmem:[%s3981_s5 + $0x180] ss:$8 sps:$4 sm:$0xff]   ;;  %v3026_v40 = vld [vmem:[%s3981_s5 + $0x190] ss:$8 sps:$4 sm:$0xff]  }
 0x35f   :  { %v1816_v30 = vrot.slane %v1815_v41, 1 }
 0x361   :  { %v1817_v42 = vadd.f32 %v1816_v30, %v1815_v41  ;;  %v3031_v41 = vld [vmem:[%s3981_s5 + $0x1a4] ss:$8 sps:$4 sm:$0xff]   ;;  %v3029_v30 = vld [vmem:[%s3981_s5 + $0x1a0] ss:$8 sps:$4 sm:$0xff]  }
 0x363   :  { %v1818_v43 = vmul.f32 0.041666668, %v1817_v42  ;;  %v3034_v42 = vld [vmem:[%s3981_s5 + $0x1b4] ss:$8 sps:$4 sm:$0xff]  }
 0x365   :  { %v1819_v44 = vadd.f32 1e-05, %v1818_v43  ;;  %v3032_v43 = vld [vmem:[%s3981_s5 + $0x1b0] ss:$8 sps:$4 sm:$0xff]  }
 0x366   :  { %v3052_v45 = vpop.eup %3051 }
 0x367   :  { %v650_v46 = vmul.f32 %v3052_v45, %v633_v2  ;;  %v651_v28 = vmul.f32 %v3052_v45, %v634_v8  ;;  %v652_v29 = vmul.f32 %v3052_v45, %v635_v10  ;;  %3053 = vrsqrt.f32 %v1819_v44  ;;  %v3004_v10 = vld [vmem:[%s3981_s5 + $0x114] ss:$8 sps:$4 sm:$0xff]   ;;  %v3037_v44 = vld [vmem:[%s3981_s5 + $0x1c4] ss:$8 sps:$4 sm:$0xff]   ;;  %v3035_v45 = vld [vmem:[%s3981_s5 + $0x1c0] ss:$8 sps:$4 sm:$0xff]  }
 0x369   :  { %vm653_vm1 = vcmp.ge.f32.partialorder %v650_v46, 0.0  ;;  %vm654_vm3 = vcmp.ge.f32.partialorder %v651_v28, 0.0  ;;  %vm655_vm4 = vcmp.ge.f32.partialorder %v652_v29, 0.0  ;;  %v656_v31 = vmul.f32 0.2, %v650_v46 }
 0x36a   :  { %v657_v32 = vmul.f32 0.2, %v651_v28  ;;  %v658_v33 = vmul.f32 0.2, %v652_v29 }
 0x36b   :  { %v659_v47 = vsel %vm653_vm1, %v650_v46, %v656_v31  ;;  %v3040_v46 = vld [vmem:[%s3981_s5 + $0x1d4] ss:$8 sps:$4 sm:$0xff]   ;;  %v3041_v31 = vld [vmem:[%s3981_s5 + $0x1e0] ss:$8 sps:$4 sm:$0xff]   ;;  %vm2435_vm1 = vcmask 8192  }
 0x36c   :  { %v660_v34 = vsel %vm654_vm3, %v651_v28, %v657_v32  ;;  %v661_v48 = vsel %vm655_vm4, %v652_v29, %v658_v33  ;;  %662 = vst [vmem:[#allocation3 + $0x8] sm:$0xff] %v659_v47  ;;  %v3038_v28 = vld [vmem:[%s3981_s5 + $0x1d0] ss:$8 sps:$4 sm:$0xff]   ;;  %v3043_v29 = vld [vmem:[%s3981_s5 + $0x1e4] ss:$8 sps:$4 sm:$0xff]  }
 0x36d   :  { %663 = vst [vmem:[#allocation3 + $0x10] sm:$0xff] %v660_v34  ;;  %664 = vst [vmem:[#allocation3 + $0x18] sm:$0xff] %v661_v48  ;;  %v3046_v32 = vld [vmem:[%s3981_s5 + $0x1f4] ss:$8 sps:$4 sm:$0xff]   ;;  %v3044_v33 = vld [vmem:[%s3981_s5 + $0x1f0] ss:$8 sps:$4 sm:$0xff]  }
 0x371   :  { %v3054_v50 = vpop.eup %3053 }
 0x372   :  { %v1821_v51 = vmul.f32 %v3054_v50, %v1804_v49  ;;  %v1822_v52 = vmul.f32 %v3054_v50, %v1805_v21  ;;  %v1823_v54 = vmul.f32 %v3054_v50, %v1806_v5 }
 0x374   :  { %vm1824_vm5 = vcmp.ge.f32.partialorder %v1821_v51, 0.0  ;;  %vm1825_vm6 = vcmp.ge.f32.partialorder %v1822_v52, 0.0  ;;  %vm1826_vm7 = vcmp.ge.f32.partialorder %v1823_v54, 0.0  ;;  %v1827_v55 = vmul.f32 0.2, %v1821_v51 }
 0x375   :  { %v1828_v56 = vmul.f32 0.2, %v1822_v52  ;;  %v1829_v57 = vmul.f32 0.2, %v1823_v54  ;;  %v670_v59 = vld [vmem:[#allocation3 + $0x8] ss:$2 sm:$0xff] }
 0x376   :  { %v1830_v60 = vsel %vm1824_vm5, %v1821_v51, %v1827_v55  ;;  %v672_v61 = vld [vmem:[#allocation3 + $0x18] ss:$2 sm:$0xf]  ;;  %v666_v62 = vld [vmem:[#allocation3 + $0x7] ss:$2 sm:$0xff]  ;;  %v751_v51 = vlaneseq }
 0x377   :  { %v1831_v63 = vsel %vm1825_vm6, %v1822_v52, %v1828_v56  ;;  %v1832_v6 = vsel %vm1826_vm7, %v1823_v54, %v1829_v57  ;;  %v682_v7 = vpack.c.bf16 %v672_v61, %v670_v59  ;;  %v668_v58 = vld [vmem:[#allocation3 + $0x17] ss:$2 sm:$0xf]  ;;  %v678_v8 = vld [vmem:[#allocation3 + $0xa] ss:$2 sm:$0xff] }
 0x378   :  { %v681_v9 = vpack.c.bf16 %v668_v58, %v666_v62  ;;  %v3792_v2 = vld [vmem:[#allocation3 + $0x9] ss:$2 sm:$0xff]  ;;  %v3797_v11 = vld [vmem:[#allocation3 + $0x19] ss:$2 sm:$0xf]  ;;  %v752_v52 = vshrl.u32 %v751_v51, 7 }
 0x379   :  { %1113 = vmatprep.mubr.bf16.mxu0 %v682_v7  ;;  %v680_v13 = vld [vmem:[#allocation3 + $0x1a] ss:$2 sm:$0xf]  ;;  %1833 = vst [vmem:[#allocation3 + $0x8] sm:$0xff] %v1830_v60  ;;  %1834 = vst [vmem:[#allocation3 + $0x10] sm:$0xff] %v1831_v63  ;;  %v683_v47 = vpack.c.bf16 %v3797_v11, %v3792_v2 }
 0x37a   :  { %1114 = vmatmul.mubr.bf16.vlgmr.msra.gmra.mrb[20].mxu0 %v681_v9  ;;  %v684_v14 = vpack.c.bf16 %v680_v13, %v678_v8  ;;  %1835 = vst [vmem:[#allocation3 + $0x18] sm:$0xff] %v1832_v6  ;;  %v753_v54 = vsub.s32 0, %v752_v52  ;;  %v749_v55 = vld [vmem:[%s3982_s6] sm:$0x3]  ;;  %v757_v56 = vsub.s32 1, %v752_v52 }
 0x37b   :  { %1125 = vmatpush1.bf16.msra.mxu0 %v2999_v53  ;;  %v1912_v13 = vld [vmem:[%s3982_s6] sm:$0x3] }
 0x37c   :  { %1156 = vmatprep.mubr.bf16.mxu0 %v684_v14  ;;  %1126 = vmatprep.subr.bf16.mxu0 %v3004_v10  ;;  %v754_v57 = vrot.slane %v749_v55, %v753_v54  ;;  %v758_v60 = vrot.slane %v749_v55, %v757_v56 }
 0x37f   :  { %1127 = vmatpush1.bf16.msra.mxu0 %v3002_v15 }
 0x380   :  { %1128 = vmatprep.subr.bf16.mxu0 %v3007_v16  ;;  %v1838_v17 = vld [vmem:[#allocation3 + $0x8] ss:$2 sm:$0xff]  ;;  %v1836_v3 = vld [vmem:[#allocation3 + $0x7] ss:$2 sm:$0xff] }
 0x381   :  { %v1839_v19 = vld [vmem:[#allocation3 + $0x18] ss:$2 sm:$0xf]  ;;  %v1837_v4 = vld [vmem:[#allocation3 + $0x17] ss:$2 sm:$0xf] }
 0x382   :  { %v1845_v20 = vpack.c.bf16 %v1839_v19, %v1838_v17  ;;  %v1844_v49 = vpack.c.bf16 %v1837_v4, %v1836_v3  ;;  %v1842_v21 = vld [vmem:[#allocation3 + $0xa] ss:$2 sm:$0xff]  ;;  %v1843_v5 = vld [vmem:[#allocation3 + $0x1a] ss:$2 sm:$0xf]  ;;  %v1921_v3 = vrot.slane %v1912_v13, %v757_v56 }
 0x383   :  { %1129 = vmatpush1.bf16.msra.mxu0 %v3005_v0  ;;  %v1847_v23 = vpack.c.bf16 %v1843_v5, %v1842_v21  ;;  %v1840_v34 = vld [vmem:[#allocation3 + $0x9] ss:$2 sm:$0xff]  ;;  %v1841_v48 = vld [vmem:[#allocation3 + $0x19] ss:$2 sm:$0xf] }
 0x384   :  { %2276 = vmatprep.mubr.bf16.mxu1 %v1845_v20  ;;  %1130 = vmatprep.subr.bf16.mxu0 %v3010_v1  ;;  %v1846_v50 = vpack.c.bf16 %v1841_v48, %v1840_v34 }
 0x385   :  { %2277 = vmatmul.mubr.bf16.vlgmr.msra.gmra.mrb[20].mxu1 %v1844_v49 }
 0x386   :  { %2288 = vmatpush1.bf16.msra.mxu1 %v2999_v53  ;;  %2319 = vmatprep.mubr.bf16.mxu1 %v1847_v23 }
 0x387   :  { %1131 = vmatpush1.bf16.msra.mxu0 %v3008_v22  ;;  %2289 = vmatprep.subr.bf16.mxu1 %v3004_v10 }
 0x388   :  { %1132 = vmatprep.subr.bf16.mxu0 %v3013_v24 }
 0x38a   :  { %2290 = vmatpush1.bf16.msra.mxu1 %v3002_v15 }
 0x38b   :  { %1133 = vmatpush1.bf16.msra.mxu0 %v3011_v25  ;;  %2291 = vmatprep.subr.bf16.mxu1 %v3007_v16 }
 0x38c   :  { %1134 = vmatprep.subr.bf16.mxu0 %v3016_v26 }
 0x38e   :  { %2292 = vmatpush1.bf16.msra.mxu1 %v3005_v0  ;;  %v1917_v0 = vrot.slane %v1912_v13, %v753_v54 }
 0x38f   :  { %1135 = vmatpush1.bf16.msra.mxu0 %v3014_v27  ;;  %2293 = vmatprep.subr.bf16.mxu1 %v3010_v1 }
 0x390   :  { %1136 = vmatprep.subr.bf16.mxu0 %v3019_v36 }
 0x392   :  { %2294 = vmatpush1.bf16.msra.mxu1 %v3008_v22 }
 0x393   :  { %1137 = vmatpush1.bf16.msra.mxu0 %v3017_v37  ;;  %2295 = vmatprep.subr.bf16.mxu1 %v3013_v24 }
 0x394   :  { %1138 = vmatprep.subr.bf16.mxu0 %v3022_v38 }
 0x396   :  { %2296 = vmatpush1.bf16.msra.mxu1 %v3011_v25 }
 0x397   :  { %1139 = vmatpush1.bf16.msra.mxu0 %v3020_v12  ;;  %2297 = vmatprep.subr.bf16.mxu1 %v3016_v26 }
 0x398   :  { %1140 = vmatprep.subr.bf16.mxu0 %v3025_v18 }
 0x39a   :  { %2298 = vmatpush1.bf16.msra.mxu1 %v3014_v27 }
 0x39b   :  { %1141 = vmatpush1.bf16.msra.mxu0 %v3023_v35  ;;  %2299 = vmatprep.subr.bf16.mxu1 %v3019_v36 }
 0x39c   :  { %1142 = vmatprep.subr.bf16.mxu0 %v3028_v39 }
 0x39e   :  { %2300 = vmatpush1.bf16.msra.mxu1 %v3017_v37 }
 0x39f   :  { %1143 = vmatpush1.bf16.msra.mxu0 %v3026_v40  ;;  %2301 = vmatprep.subr.bf16.mxu1 %v3022_v38 }
 0x3a0   :  { %1144 = vmatprep.subr.bf16.mxu0 %v3031_v41 }
 0x3a2   :  { %2302 = vmatpush1.bf16.msra.mxu1 %v3020_v12 }
 0x3a3   :  { %1145 = vmatpush1.bf16.msra.mxu0 %v3029_v30  ;;  %2303 = vmatprep.subr.bf16.mxu1 %v3025_v18 }
 0x3a4   :  { %1146 = vmatprep.subr.bf16.mxu0 %v3034_v42 }
 0x3a6   :  { %2304 = vmatpush1.bf16.msra.mxu1 %v3023_v35 }
 0x3a7   :  { %1147 = vmatpush1.bf16.msra.mxu0 %v3032_v43  ;;  %2305 = vmatprep.subr.bf16.mxu1 %v3028_v39 }
 0x3a8   :  { %1148 = vmatprep.subr.bf16.mxu0 %v3037_v44 }
 0x3aa   :  { %2306 = vmatpush1.bf16.msra.mxu1 %v3026_v40 }
 0x3ab   :  { %1149 = vmatpush1.bf16.msra.mxu0 %v3035_v45  ;;  %2307 = vmatprep.subr.bf16.mxu1 %v3031_v41 }
 0x3ac   :  { %1150 = vmatprep.subr.bf16.mxu0 %v3040_v46 }
 0x3ae   :  { %2308 = vmatpush1.bf16.msra.mxu1 %v3029_v30 }
 0x3af   :  { %1151 = vmatpush1.bf16.msra.mxu0 %v3038_v28  ;;  %2309 = vmatprep.subr.bf16.mxu1 %v3034_v42 }
 0x3b0   :  { %1152 = vmatprep.subr.bf16.mxu0 %v3043_v29 }
 0x3b2   :  { %2310 = vmatpush1.bf16.msra.mxu1 %v3032_v43 }
 0x3b3   :  { %1153 = vmatpush1.bf16.msra.mxu0 %v3041_v31  ;;  %2311 = vmatprep.subr.bf16.mxu1 %v3037_v44 }
 0x3b4   :  { %1154 = vmatprep.subr.bf16.mxu0 %v3046_v32 }
 0x3b6   :  { %2312 = vmatpush1.bf16.msra.mxu1 %v3035_v45 }
 0x3b7   :  { %1155 = vmatpush1.bf16.msra.mxu0 %v3044_v33  ;;  %2313 = vmatprep.subr.bf16.mxu1 %v3040_v46 }
 0x3ba   :  { %1157 = vmatmul.mubr.bf16.vlgmr.msra.gmra.mrb[20].mxu0 %v683_v47  ;;  %2314 = vmatpush1.bf16.msra.mxu1 %v3038_v28 }
 0x3bb   :  { %2315 = vmatprep.subr.bf16.mxu1 %v3043_v29 }
 0x3be   :  { %2316 = vmatpush1.bf16.msra.mxu1 %v3041_v31 }
 0x3bf   :  { %2317 = vmatprep.subr.bf16.mxu1 %v3046_v32 }
 0x3c2   :  { %2318 = vmatpush1.bf16.msra.mxu1 %v3044_v33 }
 0x3c5   :  { %2320 = vmatmul.mubr.bf16.vlgmr.msra.gmra.mrb[20].mxu1 %v1846_v50 }
 0x48d   :  { %v1158_v59 = vpop.f32.mrb[20].mxu0 }
 0x48e   :  { %v1160_v61 = vpop.f32.mrb[21].mxu0  ;;  %v2768_v7 = vadd.f32 %v1158_v59, %v754_v57 }
 0x48f   :  { %v1162_v62 = vpop.f32.mrb[22].mxu0  ;;  %v2769_v58 = vadd.f32 %v1160_v61, %v758_v60 }
 0x490   :  { %v2770_v63 = vadd.f32 %v1162_v62, %v754_v57  ;;  %v1164_v6 = vpop.f32.mrb[23].mxu0 }
 0x491   :  { %v2771_v53 = vadd.f32 %v1164_v6, %v758_v60 }
 0x492   :  { %v1168_v9 = vsel %vm1167_vm8, %v2770_v63, 0.0 }
 0x493   :  { %v1169_v2 = vadd.f32 %v2768_v7, %v1168_v9  ;;  %v1176_v8 = vsel %vm1167_vm8, %v2771_v53, 0.0 }
 0x494   :  { %v1177_v10 = vadd.f32 %v2769_v58, %v1176_v8 }
 0x495   :  { %v1170_v11 = vrot.slane %v1169_v2, 4 }
 0x496   :  { %v1178_v14 = vrot.slane %v1177_v10, 4 }
 0x497   :  { %v1171_v15 = vadd.f32 %v1170_v11, %v1169_v2 }
 0x498   :  { %v1179_v16 = vadd.f32 %v1178_v14, %v1177_v10  ;;  %v2321_v17 = vpop.f32.mrb[20].mxu1 }
 0x499   :  { %v1172_v1 = vrot.slane %v1171_v15, 2  ;;  %v2323_v19 = vpop.f32.mrb[21].mxu1  ;;  %v2772_v23 = vadd.f32 %v2321_v17, %v1917_v0 }
 0x49a   :  { %v1180_v4 = vrot.slane %v1179_v16, 2  ;;  %v2325_v20 = vpop.f32.mrb[22].mxu1  ;;  %v2773_v26 = vadd.f32 %v2323_v19, %v1921_v3 }
 0x49b   :  { %v1173_v49 = vadd.f32 %v1172_v1, %v1171_v15  ;;  %v2774_v21 = vadd.f32 %v2325_v20, %v1917_v0  ;;  %v2327_v5 = vpop.f32.mrb[23].mxu1 }
 0x49c   :  { %v1181_v22 = vadd.f32 %v1180_v4, %v1179_v16  ;;  %v2775_v24 = vadd.f32 %v2327_v5, %v1921_v3 }
 0x49d   :  { %v1174_v25 = vrot.slane %v1173_v49, 1  ;;  %v2330_v27 = vsel %vm1167_vm8, %v2774_v21, 0.0 }
 0x49e   :  { %v1182_v36 = vrot.slane %v1181_v22, 1  ;;  %v2331_v37 = vadd.f32 %v2772_v23, %v2330_v27  ;;  %v2338_v38 = vsel %vm1167_vm8, %v2775_v24, 0.0 }
 0x49f   :  { %v1175_v12 = vadd.f32 %v1174_v25, %v1173_v49  ;;  %v2339_v18 = vadd.f32 %v2773_v26, %v2338_v38 }
 0x4a0   :  { %v1183_v35 = vadd.f32 %v1182_v36, %v1181_v22  ;;  %v2332_v39 = vrot.slane %v2331_v37, 4 }
 0x4a1   :  { %v1185_v40 = vmul.f32 0.083333336, %v1175_v12  ;;  %v2340_v41 = vrot.slane %v2339_v18, 4 }
 0x4a2   :  { %v1186_v30 = vmul.f32 0.083333336, %v1183_v35  ;;  %v2333_v42 = vadd.f32 %v2332_v39, %v2331_v37 }
 0x4a3   :  { %v3898_v43 = vsub.f32 %v2768_v7, %v1185_v40  ;;  %v3900_v44 = vsub.f32 %v2770_v63, %v1185_v40  ;;  %v2341_v45 = vadd.f32 %v2340_v41, %v2339_v18 }
 0x4a4   :  { %v3902_v46 = vsub.f32 %v2769_v58, %v1186_v30  ;;  %v3904_v28 = vsub.f32 %v2771_v53, %v1186_v30  ;;  %v2334_v29 = vrot.slane %v2333_v42, 2 }
 0x4a5   :  { %v1191_v31 = vmul.f32 %v3898_v43, %v3898_v43  ;;  %v1193_v32 = vmul.f32 %v3900_v44, %v3900_v44  ;;  %v2342_v33 = vrot.slane %v2341_v45, 2 }
 0x4a6   :  { %v1192_v47 = vmul.f32 %v3902_v46, %v3902_v46  ;;  %v1194_v34 = vmul.f32 %v3904_v28, %v3904_v28  ;;  %v2335_v48 = vadd.f32 %v2334_v29, %v2333_v42 }
 0x4a7   :  { %v1195_v50 = vsel %vm1167_vm8, %v1193_v32, 0.0  ;;  %v2343_v51 = vadd.f32 %v2342_v33, %v2341_v45 }
 0x4a8   :  { %v1196_v52 = vadd.f32 %v1195_v50, %v1191_v31  ;;  %v1203_v54 = vsel %vm1167_vm8, %v1194_v34, 0.0  ;;  %v2336_v55 = vrot.slane %v2335_v48, 1 }
 0x4a9   :  { %v1204_v56 = vadd.f32 %v1203_v54, %v1192_v47  ;;  %v2344_v57 = vrot.slane %v2343_v51, 1 }
 0x4aa   :  { %v1197_v59 = vrot.slane %v1196_v52, 4  ;;  %v2337_v60 = vadd.f32 %v2336_v55, %v2335_v48 }
 0x4ab   :  { %v1205_v61 = vrot.slane %v1204_v56, 4  ;;  %v2345_v62 = vadd.f32 %v2344_v57, %v2343_v51  ;;  %v1233_v51 = vld [vmem:[%s3983_s7] sm:$0xff]  ;;  %v1236_v57 = vld [vmem:[%s3983_s7 + $0x18] sm:$0xf] }
 0x4ac   :  { %v1198_v63 = vadd.f32 %v1197_v59, %v1196_v52  ;;  %v2346_v6 = vmul.f32 0.083333336, %v2337_v60  ;;  %v1234_v52 = vld [vmem:[%s3983_s7 + $0x8] sm:$0xff] }
 0x4ad   :  { %v1206_v7 = vadd.f32 %v1205_v61, %v1204_v56  ;;  %v2347_v53 = vmul.f32 0.083333336, %v2345_v62 }
 0x4ae   :  { %v1199_v58 = vrot.slane %v1198_v63, 2  ;;  %v3916_v9 = vsub.f32 %v2772_v23, %v2346_v6  ;;  %v3918_v2 = vsub.f32 %v2774_v21, %v2346_v6 }
 0x4af   :  { %v1207_v8 = vrot.slane %v1206_v7, 2  ;;  %v3920_v10 = vsub.f32 %v2773_v26, %v2347_v53  ;;  %v3922_v11 = vsub.f32 %v2775_v24, %v2347_v53 }
 0x4b0   :  { %v1200_v13 = vadd.f32 %v1199_v58, %v1198_v63  ;;  %v2352_v14 = vmul.f32 %v3916_v9, %v3916_v9  ;;  %v2354_v15 = vmul.f32 %v3918_v2, %v3918_v2 }
 0x4b1   :  { %v1208_v16 = vadd.f32 %v1207_v8, %v1206_v7  ;;  %v2353_v0 = vmul.f32 %v3920_v10, %v3920_v10  ;;  %v2355_v17 = vmul.f32 %v3922_v11, %v3922_v11 }
 0x4b2   :  { %v1201_v1 = vrot.slane %v1200_v13, 1  ;;  %v2356_v3 = vsel %vm1167_vm8, %v2354_v15, 0.0 }
 0x4b3   :  { %v1209_v19 = vrot.slane %v1208_v16, 1  ;;  %v2357_v4 = vadd.f32 %v2356_v3, %v2352_v14  ;;  %v2364_v20 = vsel %vm1167_vm8, %v2355_v17, 0.0  ;;  %v2396_v3 = vld [vmem:[%s3983_s7 + $0x10] sm:$0xf] }
 0x4b4   :  { %v1202_v49 = vadd.f32 %v1201_v1, %v1200_v13  ;;  %v2365_v21 = vadd.f32 %v2364_v20, %v2353_v0 }
 0x4b5   :  { %v1210_v5 = vadd.f32 %v1209_v19, %v1208_v16  ;;  %v2358_v22 = vrot.slane %v2357_v4, 4 }
 0x4b6   :  { %v1211_v23 = vmul.f32 0.083333336, %v1202_v49  ;;  %v2366_v24 = vrot.slane %v2365_v21, 4 }
 0x4b7   :  { %v1212_v25 = vmul.f32 0.083333336, %v1210_v5  ;;  %v2359_v26 = vadd.f32 %v2358_v22, %v2357_v4 }
 0x4b8   :  { %v1213_v27 = vadd.f32 1e-05, %v1211_v23  ;;  %v2367_v36 = vadd.f32 %v2366_v24, %v2365_v21 }
 0x4b9   :  { %v1214_v37 = vadd.f32 1e-05, %v1212_v25  ;;  %v2360_v38 = vrot.slane %v2359_v26, 2 }
 0x4ba   :  { %3055 = vrsqrt.f32 %v1213_v27  ;;  %v2368_v12 = vrot.slane %v2367_v36, 2 }
 0x4bb   :  { %3057 = vrsqrt.f32 %v1214_v37  ;;  %v2361_v18 = vadd.f32 %v2360_v38, %v2359_v26 }
 0x4bc   :  { %v2369_v35 = vadd.f32 %v2368_v12, %v2367_v36 }
 0x4bd   :  { %v2362_v39 = vrot.slane %v2361_v18, 1 }
 0x4be   :  { %v2370_v40 = vrot.slane %v2369_v35, 1 }
 0x4bf   :  { %v2363_v41 = vadd.f32 %v2362_v39, %v2361_v18 }
 0x4c0   :  { %v2371_v30 = vadd.f32 %v2370_v40, %v2369_v35 }
 0x4c1   :  { %v2372_v42 = vmul.f32 0.083333336, %v2363_v41 }
 0x4c2   :  { %v2373_v45 = vmul.f32 0.083333336, %v2371_v30 }
 0x4c3   :  { %v2374_v29 = vadd.f32 1e-05, %v2372_v42 }
 0x4c4   :  { %v3056_v31 = vpop.eup %3055  ;;  %v2375_v32 = vadd.f32 1e-05, %v2373_v45 }
 0x4c5   :  { %v3058_v33 = vpop.eup %3057  ;;  %v1217_v47 = vmul.f32 %v3056_v31, %v3898_v43  ;;  %v1219_v34 = vmul.f32 %v3056_v31, %v3900_v44  ;;  %3059 = vrsqrt.f32 %v2374_v29  ;;  %v1235_v43 = vld [vmem:[%s3983_s7 + $0x10] sm:$0xf] }
 0x4c6   :  { %v1218_v48 = vmul.f32 %v3058_v33, %v3902_v46  ;;  %v1220_v50 = vmul.f32 %v3058_v33, %v3904_v28  ;;  %3061 = vrsqrt.f32 %v2375_v32 }
 0x4c7   :  { %vm1223_vm9 = vcmp.ge.f32.partialorder %v1219_v34, 0.0  ;;  %v1227_v44 = vmul.f32 0.2, %v1219_v34  ;;  %vm1221_vm10 = vcmp.ge.f32.partialorder %v1217_v47, 0.0  ;;  %v1225_v54 = vmul.f32 0.2, %v1217_v47 }
 0x4c8   :  { %v1228_v46 = vmul.f32 0.2, %v1220_v50  ;;  %vm1222_vm11 = vcmp.ge.f32.partialorder %v1218_v48, 0.0  ;;  %vm1224_vm12 = vcmp.ge.f32.partialorder %v1220_v50, 0.0  ;;  %v1226_v28 = vmul.f32 0.2, %v1218_v48 }
 0x4c9   :  { %v1229_v55 = vsel %vm1221_vm10, %v1217_v47, %v1225_v54  ;;  %v1231_v56 = vsel %vm1223_vm9, %v1219_v34, %v1227_v44 }
 0x4ca   :  { %v1230_v59 = vsel %vm1222_vm11, %v1218_v48, %v1226_v28  ;;  %v1232_v60 = vsel %vm1224_vm12, %v1220_v50, %v1228_v46  ;;  %v1237_v61 = vmul.f32 %v1233_v51, %v1229_v55  ;;  %v1239_v62 = vmul.f32 %v1235_v43, %v1231_v56 }
 0x4cb   :  { %v1238_v63 = vmul.f32 %v1234_v52, %v1230_v59  ;;  %v1240_v6 = vmul.f32 %v1236_v57, %v1232_v60 }
 0x4cc   :  { %v1242_v53 = vsel %vm1167_vm8, %v1239_v62, 0.0 }
 0x4cd   :  { %v1241_v7 = vadd.f32 %v1238_v63, %v1237_v61  ;;  %v1244_v16 = vsel %vm1167_vm8, %v1240_v6, 0.0 }
 0x4cf   :  { %v3060_v58 = vpop.eup %3059  ;;  %v1243_v8 = vadd.f32 %v1242_v53, %v1241_v7 }
 0x4d0   :  { %v3062_v13 = vpop.eup %3061  ;;  %v2378_v14 = vmul.f32 %v3060_v58, %v3916_v9  ;;  %v2380_v15 = vmul.f32 %v3060_v58, %v3918_v2 }
 0x4d1   :  { %v2379_v0 = vmul.f32 %v3062_v13, %v3920_v10  ;;  %v2381_v17 = vmul.f32 %v3062_v13, %v3922_v11  ;;  %v1245_v1 = vadd.f32 %v1244_v16, %v1243_v8  ;;  %v2397_v10 = vld [vmem:[%s3983_s7 + $0x18] sm:$0xf]  ;;  %s1256_s7 = sld [smem:[#allocation7]] }
 0x4d2   :  { %vm2384_vm13 = vcmp.ge.f32.partialorder %v2380_v15, 0.0  ;;  %v2388_v19 = vmul.f32 0.2, %v2380_v15  ;;  %vm2382_vm14 = vcmp.ge.f32.partialorder %v2378_v14, 0.0  ;;  %v2386_v4 = vmul.f32 0.2, %v2378_v14 }
 0x4d3   :  { %v2389_v20 = vmul.f32 0.2, %v2381_v17  ;;  %1246 = vadd.xlane.f32.xlu0 %v1245_v1  ;;  %vm2383_vm15 = vcmp.ge.f32.partialorder %v2379_v0, 0.0  ;;  %vm2385_vm0 = vcmp.ge.f32.partialorder %v2381_v17, 0.0  ;;  %v2387_v9 = vmul.f32 0.2, %v2379_v0 }
 0x4d4   :  { %v2390_v2 = vsel %vm2382_vm14, %v2378_v14, %v2386_v4  ;;  %v2392_v49 = vsel %vm2384_vm13, %v2380_v15, %v2388_v19 }
 0x4d5   :  { %v2391_v11 = vsel %vm2383_vm15, %v2379_v0, %v2387_v9  ;;  %v2393_v21 = vsel %vm2385_vm0, %v2381_v17, %v2389_v20  ;;  %v2398_v5 = vmul.f32 %v2390_v2, %v1233_v51  ;;  %v2400_v22 = vmul.f32 %v2396_v3, %v2392_v49 }
 0x4d6   :  { %v2399_v23 = vmul.f32 %v2391_v11, %v1234_v52  ;;  %v2401_v24 = vmul.f32 %v2397_v10, %v2393_v21  ;;  %v1262_v51 = vstv %s2562_s25 }
 0x4d7   :  { %v2403_v26 = vsel %vm1167_vm8, %v2400_v22, 0.0  ;;  %s1258_s2 = smul.f32 %s1257_s9, %s1256_s7 }
 0x4d8   :  { %v2402_v25 = vadd.f32 %v2399_v23, %v2398_v5  ;;  %v2405_v36 = vsel %vm1167_vm8, %v2401_v24, 0.0  ;;  %s2419_s4 = smul.f32 %s2673_s17, %s1256_s7 }
 0x4d9   :  { %v1259_v34 = vstv %s1258_s2 }
 0x4da   :  { %v2404_v27 = vadd.f32 %v2403_v26, %v2402_v25  ;;  %v2420_v48 = vstv %s2419_s4 }
 0x4dc   :  { %v2406_v37 = vadd.f32 %v2405_v36, %v2404_v27 }
 0x4de   :  { %2407 = vadd.xlane.f32.xlu1 %v2406_v37 }
 0x560   :  { %v1247_v38 = vpop.xlane.xlu0 %1246 }
 0x561   :  { %v1248_v12 = vrot.slane %v1247_v38, 4 }
 0x563   :  { %v1249_v18 = vadd.f32 %v1248_v12, %v1247_v38 }
 0x565   :  { %v1250_v35 = vrot.slane %v1249_v18, 2 }
 0x567   :  { %v1251_v39 = vadd.f32 %v1250_v35, %v1249_v18 }
 0x569   :  { %v1252_v40 = vrot.slane %v1251_v39, 1 }
 0x56b   :  { %v2408_v41 = vpop.xlane.xlu1 %2407  ;;  %v1253_v30 = vadd.f32 %v1252_v40, %v1251_v39 }
 0x56c   :  { %v2409_v42 = vrot.slane %v2408_v41, 4 }
 0x56d   :  { %2784 = vpush %v1253_v30 }
 0x56e   :  { %v2410_v45 = vadd.f32 %v2409_v42, %v2408_v41 }
 0x570   :  { %v2411_v29 = vrot.slane %v2410_v45, 2 }
 0x572   :  { %v2412_v31 = vadd.f32 %v2411_v29, %v2410_v45 }
 0x574   :  { %v2413_v32 = vrot.slane %v2412_v31, 1 }
 0x576   :  { %v2414_v33 = vadd.f32 %v2413_v32, %v2412_v31 }
 0x578   :  { %2786 = vpush %v2414_v33 }
 0x59e   :  { %s2785_s1 = spop %2784 }
 0x59f   :  { %v1255_v47 = vstv %s2785_s1 }
 0x5a0   :  { %v1260_v50 = vadd.f32 %v1259_v34, %v1255_v47 }
 0x5a2   :  { %v1263_v44 = vadd.f32 %v1262_v51, %v1260_v50 }
 0x5a9   :  { %s2787_s22 = spop %2786 }
 0x5aa   :  { %v2416_v52 = vstv %s2787_s22 }
 0x5ab   :  { %v2421_v43 = vadd.f32 %v2420_v48, %v2416_v52 }
 0x5ad   :  { %v2424_v54 = vadd.f32 %v2421_v43, %v1262_v51 }
 0x5af   :  { %v2426_v46 = vsel %vm2425_vm2, %v1263_v44, %v2424_v54 }
 0x5b0   :  { %v2675_v28 = vclamps-f32 %v2426_v46, 30.0 }
 0x5b2   :  { %v2429_v55 = vsub.f32 0.0, %v2675_v28 }
 0x5b4   :  { %v2430_v56 = vmul.f32 1.442695, %v2429_v55 }
 0x5b6   :  { %3063 = vpow2.f32 %v2430_v56 }
 0x5c0   :  { %v3064_v57 = vpop.eup %3063 }
 0x5c1   :  { %v2432_v59 = vadd.f32 1.0, %v3064_v57 }
 0x5c3   :  { %3065 = vrcp.f32 %v2432_v59 }
 0x5cd   :  { %v3066_v60 = vpop.eup %3065 }
 0x5ce   :  { %2436 = vst.msk [vmem:[#allocation9] sm:$0x1] %vm2435_vm1, %v3066_v60 }
 0x5cf   :  { %3102 = shalt.err (!%p3099_p0)
}
 0x5d0   :  { %s3103_s5 = scalar_lea.hbm %s3986_s10, 16 }
 0x5d1   :  { %p3104_p1 = scmp.ne.s32.totalorder %s3986_s10, %s3103_s5  ;;  %p3107_p2 = scmp.lt.u32.totalorder %s3103_s5, %s3986_s10 }
 0x5d3   :  { %p3109_p3 = pnand %p3107_p2, %p3104_p1 }
 0x5d5   :  { %3112 = shalt.err (!%p3109_p3)
}
 0x5d6   :  { %2446 = dma.vmem_to_hbm [thread:$0]  %s2444_s24, 16, %s3986_s10, [#allocation5]  }
 0x5d7   :  { %3117 = dma.done.wait [#allocation5], 16  }
 0x5d8   :  { %3118 = vsyncadd [#allocation5], 4294967280 }
 0x5d9   :  { %2450 = vsyncpa [#allocation5], 1 }
 0x5da   :  { %2451 = vsyncpa [#allocation6], 1 }
 0x5db   :  { %2452 = vsyncpa [#allocation8], 1 }

</bundles_post_ra>
